<compile_context>
chip_gen: v7x
topology: tpu7x:2x2x1
jax: 0.10.0
libtpu: 0.0.40
codegen_flags: <defaults>
</compile_context>

<pallas_src>
import functools
import math

import jax
import jax.numpy as jnp
from jax.experimental import pallas as pl
from jax.experimental.pallas import tpu as pltpu


# ---------------------------------------------------------------------------
# Hardware / VMEM helpers.
# ---------------------------------------------------------------------------
def _get_vmem_capacity():
    try:
        info = pltpu.get_tpu_info()
        cap = getattr(info, "vmem_capacity_bytes", None)
        if cap:
            return int(cap)
    except Exception:
        pass
    return 64 * 1024 * 1024          # conservative (v7x per-TC)


def _vmem_limit(vmem_cap):
    # Scoped-VMEM limit with headroom for compiler scratch.
    return int(min(vmem_cap * 3 // 4, 100 * 1024 * 1024))


def _pick_block_nseq(n_seq, seq_half, cp, vmem_cap):
    """Number of sequences per attention grid step.

    Budgeted from VMEM capacity (double-buffered bf16 weights + f32
    activations/intermediates per sequence) and capped so the grid stays >= 2
    (both v7x TensorCores get work)."""
    weight_bytes = 2 * (6 * cp * cp * 2) + 2 * (2 * seq_half * cp * 4)
    per_seq = 80 * seq_half * cp + 16 * seq_half * seq_half       # conservative
    budget = int(vmem_cap * 0.45)
    cap = max(1, (budget - weight_bytes) // per_seq)
    if n_seq >= 2:
        cap = min(cap, n_seq // 2)
    divisors = [d for d in range(1, n_seq + 1) if n_seq % d == 0 and d <= cap]
    return max(divisors) if divisors else 1


# ---------------------------------------------------------------------------
# Pallas kernel: pos-embed + LayerNorm + attention over [hid | ref] keys with
# hid rows as queries.  Per grid step: nb sequences, each of query length L and
# key length 2L (L hid keys + L ref keys).  No concatenation anywhere.
#
#   xq_ref   : (nb, L, Cp)  query-side rows (hid / res1), f32
#   xr_ref   : (nb, L, Cp)  reference rows, f32
#   pe_ref   : (2L, Cp)     sinusoidal positional embedding, f32
#   g/b_ref  : (1, Cp)      LayerNorm affine (zero on padded lanes)
#   wqkv_ref : (Cp, 3Cp)    bf16, packed [Wq*scale | Wk | Wv]
#   wkv_ref  : (Cp, 2Cp)    bf16, packed [Wk | Wv]
#   wo_ref   : (Cp, Cp)     bf16
#   bo_ref   : (1, Cp)      f32
#   o_ref    : (nb, L, Cp)
# ---------------------------------------------------------------------------
def _attn_branch_kernel(xq_ref, xr_ref, pe_ref, g_ref, b_ref, wqkv_ref, wkv_ref,
                        wo_ref, bo_ref, o_ref, *, nb, L, real_c, num_heads, eps):
    Cp = xq_ref.shape[-1]
    inv_c = 1.0 / float(real_c)
    gamma = g_ref[...].astype(jnp.float32)
    beta = b_ref[...].astype(jnp.float32)

    def layer_norm(x):                       # x: (nb, L, Cp), padded lanes are 0
        mean = jnp.sum(x, axis=-1, keepdims=True) * inv_c
        ex2 = jnp.sum(x * x, axis=-1, keepdims=True) * inv_c
        var = jnp.maximum(ex2 - mean * mean, 0.0)
        return (x - mean) * jax.lax.rsqrt(var + eps) * gamma + beta

    xh = xq_ref[...].astype(jnp.float32) + pe_ref[0:L, :]
    xr = xr_ref[...].astype(jnp.float32) + pe_ref[L:2 * L, :]

    xh_n = layer_norm(xh).reshape(nb * L, Cp).astype(jnp.bfloat16)
    xr_n = layer_norm(xr).reshape(nb * L, Cp).astype(jnp.bfloat16)

    # Projections: one packed matmul per side, f32 accumulation on the MXU.
    qkv = jnp.dot(xh_n, wqkv_ref[...], preferred_element_type=jnp.float32)
    kvr = jnp.dot(xr_n, wkv_ref[...], preferred_element_type=jnp.float32)

    q = qkv[:, 0 * Cp:1 * Cp].reshape(nb, L, Cp)      # already scaled (folded)
    kh = qkv[:, 1 * Cp:2 * Cp].reshape(nb, L, Cp)
    vh = qkv[:, 2 * Cp:3 * Cp].reshape(nb, L, Cp)
    kr = kvr[:, 0 * Cp:1 * Cp].reshape(nb, L, Cp)
    vr = kvr[:, 1 * Cp:2 * Cp].reshape(nb, L, Cp)

    nh = num_heads
    if nh > 1:                               # fold heads into the batch dim
        dh = Cp // nh

        def split(t):
            t = jnp.transpose(t.reshape(nb, L, nh, dh), (0, 2, 1, 3))
            return t.reshape(nb * nh, L, dh)

        q, kh, vh, kr, vr = (split(t) for t in (q, kh, vh, kr, vr))

    qb = q.astype(jnp.bfloat16)
    s_h = jnp.einsum('bqd,bkd->bqk', qb, kh.astype(jnp.bfloat16),
                     preferred_element_type=jnp.float32)
    s_r = jnp.einsum('bqd,bkd->bqk', qb, kr.astype(jnp.bfloat16),
                     preferred_element_type=jnp.float32)

    # Joint softmax over the two key groups (no concat).
    m = jnp.maximum(jnp.max(s_h, axis=-1, keepdims=True),
                    jnp.max(s_r, axis=-1, keepdims=True))
    p_h = jnp.exp(s_h - m)
    p_r = jnp.exp(s_r - m)
    denom = jnp.sum(p_h, axis=-1, keepdims=True) + jnp.sum(p_r, axis=-1, keepdims=True)

    ctx = (jnp.einsum('bqk,bkd->bqd', p_h.astype(jnp.bfloat16),
                      vh.astype(jnp.bfloat16), preferred_element_type=jnp.float32)
           + jnp.einsum('bqk,bkd->bqd', p_r.astype(jnp.bfloat16),
                        vr.astype(jnp.bfloat16), preferred_element_type=jnp.float32))
    ctx = ctx * pl.reciprocal(denom, approx=True)

    if nh > 1:
        ctx = jnp.transpose(ctx.reshape(nb, nh, L, dh), (0, 2, 1, 3)).reshape(nb, L, Cp)

    out = jnp.dot(ctx.reshape(nb * L, Cp).astype(jnp.bfloat16), wo_ref[...],
                  preferred_element_type=jnp.float32)
    out = out + bo_ref[...].astype(jnp.float32)
    o_ref[...] = out.reshape(nb, L, Cp).astype(o_ref.dtype)


def attention_branch(xq, xr, pe, gamma, beta, wqkv, wkv, wo, bo, *,
                     real_c, num_heads, eps, vmem_cap):
    """xq, xr: (N, L, Cp).  Returns attn output for the query rows, (N, L, Cp)."""
    N, L, Cp = xq.shape
    nb = _pick_block_nseq(N, L, Cp, vmem_cap)
    kernel = functools.partial(_attn_branch_kernel, nb=nb, L=L, real_c=real_c,
                               num_heads=num_heads, eps=eps)
    flops = int(N * (12 * L * Cp * Cp + 8 * L * L * Cp))
    bytes_accessed = int(3 * N * L * Cp * 4 + 6 * Cp * Cp * 2 + 2 * L * Cp * 4)
    cost = pl.CostEstimate(flops=flops, transcendentals=int(2 * N * L * L),
                           bytes_accessed=bytes_accessed)
    # TODO(synk): constant-index blocks (pe/weights) could use
    # pipeline_mode=pl.Buffered(1) to reclaim their second VMEM buffer on v7x.
    return pl.pallas_call(
        kernel,
        out_shape=jax.ShapeDtypeStruct((N, L, Cp), xq.dtype),
        grid=(N // nb,),
        in_specs=[
            pl.BlockSpec((nb, L, Cp), lambda i: (i, 0, 0)),     # query-side rows
            pl.BlockSpec((nb, L, Cp), lambda i: (i, 0, 0)),     # reference rows
            pl.BlockSpec((2 * L, Cp), lambda i: (0, 0)),        # pos embed
            pl.BlockSpec((1, Cp), lambda i: (0, 0)),            # ln gamma
            pl.BlockSpec((1, Cp), lambda i: (0, 0)),            # ln beta
            pl.BlockSpec((Cp, 3 * Cp), lambda i: (0, 0)),       # [Wq*s | Wk | Wv]
            pl.BlockSpec((Cp, 2 * Cp), lambda i: (0, 0)),       # [Wk | Wv]
            pl.BlockSpec((Cp, Cp), lambda i: (0, 0)),           # Wo
            pl.BlockSpec((1, Cp), lambda i: (0, 0)),            # out bias
        ],
        out_specs=pl.BlockSpec((nb, L, Cp), lambda i: (i, 0, 0)),
        compiler_params=pltpu.CompilerParams(
            dimension_semantics=("parallel",),
            vmem_limit_bytes=_vmem_limit(vmem_cap)),
        cost_estimate=cost,
    )(xq, xr, pe, gamma, beta, wqkv, wkv, wo, bo)


# ---------------------------------------------------------------------------
# Pallas kernel: 3x3 "same" conv, one image per grid step.  The 1-pixel halo is
# built in-kernel (zero concats, no wrapper pad) and the 3 dx taps are packed
# into one (3*Cp, Cp) weight, so each step runs 3 matmuls with K = 3*Cp.
#   x_ref : (1, S1, S2, Cp)  input image, f32
#   w_ref : (3, 3*Cp, Cp)    bf16 packed taps (rows d2*Cp:(d2+1)*Cp = tap (d1,d2))
#   b_ref : (1, Cp)          f32
#   o_ref : (1, S1, S2, Cp)
# ---------------------------------------------------------------------------
def _conv3x3_kernel(x_ref, w_ref, b_ref, o_ref):
    _, S1, S2, Cp = x_ref.shape
    x = x_ref[0].astype(jnp.bfloat16)                              # (S1, S2, Cp)
    zc = jnp.zeros((S1, 1, Cp), jnp.bfloat16)
    xw = jnp.concatenate([zc, x, zc], axis=1)                      # (S1, S2+2, Cp)
    zr = jnp.zeros((1, S2 + 2, Cp), jnp.bfloat16)
    xp = jnp.concatenate([zr, xw, zr], axis=0)                     # (S1+2, S2+2, Cp)

    acc = jnp.zeros((S1 * S2, Cp), jnp.float32)
    for d1 in range(3):
        rows = xp[d1:d1 + S1]                                      # (S1, S2+2, Cp)
        patch = jnp.concatenate(
            [rows[:, 0:S2], rows[:, 1:S2 + 1], rows[:, 2:S2 + 2]], axis=-1)
        acc = acc + jnp.dot(patch.reshape(S1 * S2, 3 * Cp), w_ref[d1],
                            preferred_element_type=jnp.float32)
    acc = acc + b_ref[...].astype(jnp.float32)
    o_ref[0] = acc.reshape(S1, S2, Cp).astype(o_ref.dtype)


def conv3x3(x, w_packed, bias, *, vmem_cap):
    """x: (B, S1, S2, Cp).  Returns conv3x3(x) with 'same' padding, (B,S1,S2,Cp)."""
    B, S1, S2, Cp = x.shape
    # TODO(synk): for very large S1*S2, tile over row groups with an explicit
    # 1-row halo instead of one full image per grid step.
    flops = int(B * S1 * S2 * 2 * 9 * Cp * Cp)
    cost = pl.CostEstimate(flops=flops, transcendentals=0,
                           bytes_accessed=int(2 * B * S1 * S2 * Cp * 4 + 9 * Cp * Cp * 2))
    return pl.pallas_call(
        _conv3x3_kernel,
        out_shape=jax.ShapeDtypeStruct((B, S1, S2, Cp), x.dtype),
        grid=(B,),
        in_specs=[
            pl.BlockSpec((1, S1, S2, Cp), lambda b: (b, 0, 0, 0)),
            pl.BlockSpec((3, 3 * Cp, Cp), lambda b: (0, 0, 0)),
            pl.BlockSpec((1, Cp), lambda b: (0, 0)),
        ],
        out_specs=pl.BlockSpec((1, S1, S2, Cp), lambda b: (b, 0, 0, 0)),
        compiler_params=pltpu.CompilerParams(
            dimension_semantics=("parallel",),
            vmem_limit_bytes=_vmem_limit(vmem_cap)),
        cost_estimate=cost,
    )(x, w_packed, bias)


# ---------------------------------------------------------------------------
# Parameter construction (deterministic, synthetic) with lane padding + packing.
# ---------------------------------------------------------------------------
def _pad_cols(a, cp):
    c = a.shape[-1]
    if c == cp:
        return a
    pad = [(0, 0)] * (a.ndim - 1) + [(0, cp - c)]
    return jnp.pad(a, pad)


def _pad2(a, cp):
    c0, c1 = a.shape
    if c0 == cp and c1 == cp:
        return a
    return jnp.pad(a, ((0, cp - c0), (0, cp - c1)))


def sinusoidal_pe(max_len, dim):
    position = jnp.arange(max_len, dtype=jnp.float32)[:, None]
    div_term = jnp.exp(jnp.arange(0, dim, 2, dtype=jnp.float32)
                       * (-math.log(10000.0) / dim))
    pe = jnp.zeros((max_len, dim), jnp.float32)
    pe = pe.at[:, 0::2].set(jnp.sin(position * div_term))
    pe = pe.at[:, 1::2].set(jnp.cos(position * div_term))
    return pe


def _pack_conv_swapped(w_hwio, cp):
    """Pack HWIO 3x3 weights for a conv running in the (B, W, H, C) layout:
    out[d1] rows [d2*cp:(d2+1)*cp] = w_hwio[dy=d2, dx=d1], zero-padded to cp."""
    blocks = []
    for d1 in range(3):
        cols = [_pad2(w_hwio[d2, d1], cp) for d2 in range(3)]
        blocks.append(jnp.concatenate(cols, axis=0))               # (3cp, cp)
    return jnp.stack(blocks, axis=0).astype(jnp.bfloat16)           # (3, 3cp, cp)


def init_params(key, C, num_heads=1, max_pos=128):
    assert C % num_heads == 0
    cp = 128 if (C < 128 and num_heads == 1) else C     # lane-dense padding
    scale = float(C // num_heads) ** -0.5
    keys = jax.random.split(key, 12)
    lin = lambda k: 0.05 * jax.random.normal(k, (C, C), jnp.float32)
    vec = lambda v: _pad_cols(v.reshape(1, C), cp)
    wq1, wk1, wv1, wo1 = lin(keys[0]), lin(keys[1]), lin(keys[2]), lin(keys[3])
    wq2, wk2, wv2, wo2 = lin(keys[4]), lin(keys[5]), lin(keys[6]), lin(keys[7])

    def qkv_pack(wq, wk, wv):       # scale folded into Wq at init time
        return jnp.concatenate(
            [_pad2(wq * scale, cp), _pad2(wk, cp), _pad2(wv, cp)],
            axis=1).astype(jnp.bfloat16)

    def kv_pack(wk, wv):
        return jnp.concatenate([_pad2(wk, cp), _pad2(wv, cp)],
                               axis=1).astype(jnp.bfloat16)

    return dict(
        pe=_pad_cols(sinusoidal_pe(max_pos, C), cp),
        ln_g=vec(jnp.ones((C,), jnp.float32)),
        ln_b=vec(jnp.zeros((C,), jnp.float32)),
        wqkv1=qkv_pack(wq1, wk1, wv1),
        wkv1=kv_pack(wk1, wv1),
        wo1=_pad2(wo1, cp).astype(jnp.bfloat16),
        bo1=vec(0.01 * jax.random.normal(keys[8], (C,), jnp.float32)),
        wqkv2=qkv_pack(wq2, wk2, wv2),
        wkv2=kv_pack(wk2, wv2),
        wo2=_pad2(wo2, cp).astype(jnp.bfloat16),
        bo2=vec(0.01 * jax.random.normal(keys[9], (C,), jnp.float32)),
        # NOTE: the reference zero-inits `proj` (zero_module); small nonzero
        # deterministic values are used so the conv kernel is exercised.
        conv_w=_pack_conv_swapped(
            0.01 * jax.random.normal(keys[10], (3, 3, C, C), jnp.float32), cp),
        conv_b=vec(0.01 * jax.random.normal(keys[11], (C,), jnp.float32)),
    )


# ---------------------------------------------------------------------------
# Full forward pass (matches SKReferenceAttentionV3.forward).
# ---------------------------------------------------------------------------
def sk_reference_attention_v3(hidden_states, ref_stats, num_frames, params,
                              *, num_heads=1, eps=1e-5):
    B, C, H, W = hidden_states.shape
    Cp = params["ln_g"].shape[-1]
    pe = params["pe"]
    assert pe.shape[0] >= 2 * max(H, W), "positional embedding table too small"
    vmem_cap = _get_vmem_capacity()

    ref = ref_stats
    if ref.shape[0] != B:
        ref = jnp.repeat(ref, num_frames, axis=0)       # repeat_interleave

    hid_nhwc = _pad_cols(jnp.transpose(hidden_states, (0, 2, 3, 1)), Cp)  # (B,H,W,Cp)
    ref_nhwc = _pad_cols(jnp.transpose(ref, (0, 2, 3, 1)), Cp)            # (B,H,W,Cp)

    # Branch 1: per (b, h) row, queries = hid columns, keys = [hid | ref] columns.
    res1 = attention_branch(
        hid_nhwc.reshape(B * H, W, Cp), ref_nhwc.reshape(B * H, W, Cp),
        pe[:2 * W], params["ln_g"], params["ln_b"],
        params["wqkv1"], params["wkv1"], params["wo1"], params["bo1"],
        real_c=C, num_heads=num_heads, eps=eps, vmem_cap=vmem_cap)        # (B*H,W,Cp)

    # Branch 2 runs in the (b, w, h) layout: one transpose per tensor, no concat.
    res1_whc = jnp.transpose(res1.reshape(B, H, W, Cp), (0, 2, 1, 3))     # (B,W,H,Cp)
    ref_whc = jnp.transpose(ref_nhwc, (0, 2, 1, 3))                       # (B,W,H,Cp)
    res2_whc = attention_branch(
        res1_whc.reshape(B * W, H, Cp), ref_whc.reshape(B * W, H, Cp),
        pe[:2 * H], params["ln_g"], params["ln_b"],
        params["wqkv2"], params["wkv2"], params["wo2"], params["bo2"],
        real_c=C, num_heads=num_heads, eps=eps, vmem_cap=vmem_cap)        # (B*W,H,Cp)

    # 3x3 conv directly in the (B, W, H, Cp) layout (spatially swapped taps), so
    # res2 never needs a transpose before the conv.
    conv_whc = conv3x3(res2_whc.reshape(B, W, H, Cp), params["conv_w"],
                       params["conv_b"], vmem_cap=vmem_cap)               # (B,W,H,Cp)

    # Residual + un-pad + back to NCHW: one fused XLA pass on the final transpose.
    return hidden_states + jnp.transpose(conv_whc[..., :C], (0, 3, 2, 1))


if __name__ == "__main__":
    key = jax.random.PRNGKey(0)
    B, C, H, W = 2, 32, 8, 8
    num_frames = 2
    k1, k2, k3 = jax.random.split(key, 3)
    hidden_states = jax.random.normal(k1, (B, C, H, W), jnp.float32)
    ref_stats = jax.random.normal(k2, (B // num_frames, C, H, W), jnp.float32)
    params = init_params(k3, C, num_heads=1)

    @jax.jit
    def fwd(h, r, p):
        return sk_reference_attention_v3(h, r, num_frames, p, num_heads=1, eps=1e-5)

    out = jax.block_until_ready(fwd(hidden_states, ref_stats, params))
    assert out.shape == hidden_states.shape and out.dtype == jnp.float32
    print("KERNEL_OK")
</pallas_src>

<mosaic_0001>
module attributes {stable_mosaic.version = 11 : i64} {
  func.func @_conv3x3_kernel(%arg0: i32, %arg1: memref<1x8x8x128xf32, #tpu.memory_space<vmem>>, %arg2: memref<3x384x128xbf16, #tpu.memory_space<vmem>>, %arg3: memref<1x128xf32, #tpu.memory_space<vmem>>, %arg4: memref<1x8x8x128xf32, #tpu.memory_space<vmem>>) attributes {dimension_semantics = [#tpu.dimension_semantics<parallel>], iteration_bounds = array<i64: 2>, scalar_prefetch = 0 : i64, scratch_operands = 0 : i64, tpu.core_type = #tpu.core_type<tc>, window_params = [{transform_indices = @transform_0, window_bounds = array<i64: 1, 8, 8, 128>}, {pipeline_mode = #tpu.pipeline_mode<synchronous>, transform_indices = @transform_1, window_bounds = array<i64: 3, 384, 128>}, {pipeline_mode = #tpu.pipeline_mode<synchronous>, transform_indices = @transform_2, window_bounds = array<i64: 1, 128>}, {transform_indices = @transform_3, window_bounds = array<i64: 1, 8, 8, 128>}]} {
    %c0 = arith.constant 0 : index
    %c0_0 = arith.constant 0 : index
    %c0_1 = arith.constant 0 : index
    %c0_2 = arith.constant 0 : index
    %0 = vector.load %arg1[%c0, %c0_0, %c0_1, %c0_2] : memref<1x8x8x128xf32, #tpu.memory_space<vmem>>, vector<1x8x8x128xf32>
    %1 = vector.shape_cast %0 : vector<1x8x8x128xf32> to vector<8x8x128xf32>
    %2 = arith.truncf %1 : vector<8x8x128xf32> to vector<8x8x128xbf16>
    %cst = arith.constant 0.000000e+00 : bf16
    %3 = vector.broadcast %cst : bf16 to vector<8x1x128xbf16>
    %4 = tpu.concatenate %3, %2, %3 in 1 : vector<8x1x128xbf16>, vector<8x8x128xbf16>, vector<8x1x128xbf16> -> vector<8x10x128xbf16>
    %cst_3 = arith.constant 0.000000e+00 : bf16
    %5 = vector.broadcast %cst_3 : bf16 to vector<1x10x128xbf16>
    %6 = tpu.concatenate %5, %4, %5 in 0 : vector<1x10x128xbf16>, vector<8x10x128xbf16>, vector<1x10x128xbf16> -> vector<10x10x128xbf16>
    %cst_4 = arith.constant 0.000000e+00 : f32
    %7 = vector.broadcast %cst_4 : f32 to vector<64x128xf32>
    %8 = vector.extract_strided_slice %6 {offsets = [0, 0, 0], sizes = [8, 10, 128], strides = [1, 1, 1]} : vector<10x10x128xbf16> to vector<8x10x128xbf16>
    %9 = vector.extract_strided_slice %8 {offsets = [0, 0, 0], sizes = [8, 8, 128], strides = [1, 1, 1]} : vector<8x10x128xbf16> to vector<8x8x128xbf16>
    %10 = vector.extract_strided_slice %8 {offsets = [0, 1, 0], sizes = [8, 8, 128], strides = [1, 1, 1]} : vector<8x10x128xbf16> to vector<8x8x128xbf16>
    %11 = vector.extract_strided_slice %8 {offsets = [0, 2, 0], sizes = [8, 8, 128], strides = [1, 1, 1]} : vector<8x10x128xbf16> to vector<8x8x128xbf16>
    %12 = tpu.concatenate %9, %10, %11 in 2 : vector<8x8x128xbf16>, vector<8x8x128xbf16>, vector<8x8x128xbf16> -> vector<8x8x384xbf16>
    %13 = vector.shape_cast %12 : vector<8x8x384xbf16> to vector<64x384xbf16>
    %c0_5 = arith.constant 0 : index
    %c0_6 = arith.constant 0 : index
    %c0_7 = arith.constant 0 : index
    %14 = vector.load %arg2[%c0_5, %c0_6, %c0_7] : memref<3x384x128xbf16, #tpu.memory_space<vmem>>, vector<1x384x128xbf16>
    %15 = vector.shape_cast %14 : vector<1x384x128xbf16> to vector<384x128xbf16>
    %cst_8 = arith.constant dense<0.000000e+00> : vector<64x128xf32>
    %16 = tpu.matmul %13, %15, %cst_8 {dimension_numbers = #tpu.dot_dimension_numbers<[1], [0], [0], [1], [0, 0, 1, 1], [], []>} : vector<64x384xbf16>, vector<384x128xbf16>, vector<64x128xf32> -> vector<64x128xf32>
    %17 = arith.addf %7, %16 : vector<64x128xf32>
    %18 = vector.extract_strided_slice %6 {offsets = [1, 0, 0], sizes = [8, 10, 128], strides = [1, 1, 1]} : vector<10x10x128xbf16> to vector<8x10x128xbf16>
    %19 = vector.extract_strided_slice %18 {offsets = [0, 0, 0], sizes = [8, 8, 128], strides = [1, 1, 1]} : vector<8x10x128xbf16> to vector<8x8x128xbf16>
    %20 = vector.extract_strided_slice %18 {offsets = [0, 1, 0], sizes = [8, 8, 128], strides = [1, 1, 1]} : vector<8x10x128xbf16> to vector<8x8x128xbf16>
    %21 = vector.extract_strided_slice %18 {offsets = [0, 2, 0], sizes = [8, 8, 128], strides = [1, 1, 1]} : vector<8x10x128xbf16> to vector<8x8x128xbf16>
    %22 = tpu.concatenate %19, %20, %21 in 2 : vector<8x8x128xbf16>, vector<8x8x128xbf16>, vector<8x8x128xbf16> -> vector<8x8x384xbf16>
    %23 = vector.shape_cast %22 : vector<8x8x384xbf16> to vector<64x384xbf16>
    %c1 = arith.constant 1 : index
    %c0_9 = arith.constant 0 : index
    %c0_10 = arith.constant 0 : index
    %24 = vector.load %arg2[%c1, %c0_9, %c0_10] : memref<3x384x128xbf16, #tpu.memory_space<vmem>>, vector<1x384x128xbf16>
    %25 = vector.shape_cast %24 : vector<1x384x128xbf16> to vector<384x128xbf16>
    %cst_11 = arith.constant dense<0.000000e+00> : vector<64x128xf32>
    %26 = tpu.matmul %23, %25, %cst_11 {dimension_numbers = #tpu.dot_dimension_numbers<[1], [0], [0], [1], [0, 0, 1, 1], [], []>} : vector<64x384xbf16>, vector<384x128xbf16>, vector<64x128xf32> -> vector<64x128xf32>
    %27 = arith.addf %17, %26 : vector<64x128xf32>
    %28 = vector.extract_strided_slice %6 {offsets = [2, 0, 0], sizes = [8, 10, 128], strides = [1, 1, 1]} : vector<10x10x128xbf16> to vector<8x10x128xbf16>
    %29 = vector.extract_strided_slice %28 {offsets = [0, 0, 0], sizes = [8, 8, 128], strides = [1, 1, 1]} : vector<8x10x128xbf16> to vector<8x8x128xbf16>
    %30 = vector.extract_strided_slice %28 {offsets = [0, 1, 0], sizes = [8, 8, 128], strides = [1, 1, 1]} : vector<8x10x128xbf16> to vector<8x8x128xbf16>
    %31 = vector.extract_strided_slice %28 {offsets = [0, 2, 0], sizes = [8, 8, 128], strides = [1, 1, 1]} : vector<8x10x128xbf16> to vector<8x8x128xbf16>
    %32 = tpu.concatenate %29, %30, %31 in 2 : vector<8x8x128xbf16>, vector<8x8x128xbf16>, vector<8x8x128xbf16> -> vector<8x8x384xbf16>
    %33 = vector.shape_cast %32 : vector<8x8x384xbf16> to vector<64x384xbf16>
    %c2 = arith.constant 2 : index
    %c0_12 = arith.constant 0 : index
    %c0_13 = arith.constant 0 : index
    %34 = vector.load %arg2[%c2, %c0_12, %c0_13] : memref<3x384x128xbf16, #tpu.memory_space<vmem>>, vector<1x384x128xbf16>
    %35 = vector.shape_cast %34 : vector<1x384x128xbf16> to vector<384x128xbf16>
    %cst_14 = arith.constant dense<0.000000e+00> : vector<64x128xf32>
    %36 = tpu.matmul %33, %35, %cst_14 {dimension_numbers = #tpu.dot_dimension_numbers<[1], [0], [0], [1], [0, 0, 1, 1], [], []>} : vector<64x384xbf16>, vector<384x128xbf16>, vector<64x128xf32> -> vector<64x128xf32>
    %37 = arith.addf %27, %36 : vector<64x128xf32>
    %c0_15 = arith.constant 0 : index
    %c0_16 = arith.constant 0 : index
    %38 = vector.load %arg3[%c0_15, %c0_16] : memref<1x128xf32, #tpu.memory_space<vmem>>, vector<1x128xf32>
    %39 = vector.broadcast %38 : vector<1x128xf32> to vector<64x128xf32>
    %40 = arith.addf %37, %39 : vector<64x128xf32>
    %41 = vector.shape_cast %40 : vector<64x128xf32> to vector<8x8x128xf32>
    %c0_17 = arith.constant 0 : index
    %c0_18 = arith.constant 0 : index
    %c0_19 = arith.constant 0 : index
    %c0_20 = arith.constant 0 : index
    %42 = vector.load %arg4[%c0_17, %c0_18, %c0_19, %c0_20] : memref<1x8x8x128xf32, #tpu.memory_space<vmem>>, vector<1x8x8x128xf32>
    %43 = vector.shape_cast %42 : vector<1x8x8x128xf32> to vector<8x8x128xf32>
    %44 = vector.shape_cast %41 : vector<8x8x128xf32> to vector<1x8x8x128xf32>
    tpu.vector_store %arg4[%c0_17, %c0_18, %c0_19, %c0_20], %44 {strides = array<i32>} : memref<1x8x8x128xf32, #tpu.memory_space<vmem>>, vector<1x8x8x128xf32>,
    return
  }
  func.func @transform_0(%arg0: i32) -> (i32, i32, i32, i32) {
    %c0_i32 = arith.constant 0 : i32
    %c0_i32_0 = arith.constant 0 : i32
    %c0_i32_1 = arith.constant 0 : i32
    %c0_i32_2 = arith.constant 0 : i32
    return %arg0, %c0_i32, %c0_i32_0, %c0_i32_1 : i32, i32, i32, i32
  }
  func.func @transform_1(%arg0: i32) -> (i32, i32, i32) {
    %c0_i32 = arith.constant 0 : i32
    %c0_i32_0 = arith.constant 0 : i32
    %c0_i32_1 = arith.constant 0 : i32
    %c0_i32_2 = arith.constant 0 : i32
    return %c0_i32, %c0_i32_0, %c0_i32_1 : i32, i32, i32
  }
  func.func @transform_2(%arg0: i32) -> (i32, i32) {
    %c0_i32 = arith.constant 0 : i32
    %c0_i32_0 = arith.constant 0 : i32
    %c0_i32_1 = arith.constant 0 : i32
    return %c0_i32, %c0_i32_0 : i32, i32
  }
  func.func @transform_3(%arg0: i32) -> (i32, i32, i32, i32) {
    %c0_i32 = arith.constant 0 : i32
    %c0_i32_0 = arith.constant 0 : i32
    %c0_i32_1 = arith.constant 0 : i32
    %c0_i32_2 = arith.constant 0 : i32
    return %arg0, %c0_i32, %c0_i32_0, %c0_i32_1 : i32, i32, i32, i32
  }
}

module attributes {stable_mosaic.version = 11 : i64} {
  func.func @_attn_branch_kernel(%arg0: i32, %arg1: memref<8x8x128xf32, #tpu.memory_space<vmem>>, %arg2: memref<8x8x128xf32, #tpu.memory_space<vmem>>, %arg3: memref<16x128xf32, #tpu.memory_space<vmem>>, %arg4: memref<1x128xf32, #tpu.memory_space<vmem>>, %arg5: memref<1x128xf32, #tpu.memory_space<vmem>>, %arg6: memref<128x384xbf16, #tpu.memory_space<vmem>>, %arg7: memref<128x256xbf16, #tpu.memory_space<vmem>>, %arg8: memref<128x128xbf16, #tpu.memory_space<vmem>>, %arg9: memref<1x128xf32, #tpu.memory_space<vmem>>, %arg10: memref<8x8x128xf32, #tpu.memory_space<vmem>>) attributes {dimension_semantics = [#tpu.dimension_semantics<parallel>], iteration_bounds = array<i64: 2>, scalar_prefetch = 0 : i64, scratch_operands = 0 : i64, tpu.core_type = #tpu.core_type<tc>, window_params = [{transform_indices = @transform_0, window_bounds = array<i64: 8, 8, 128>}, {transform_indices = @transform_1, window_bounds = array<i64: 8, 8, 128>}, {pipeline_mode = #tpu.pipeline_mode<synchronous>, transform_indices = @transform_2, window_bounds = array<i64: 16, 128>}, {pipeline_mode = #tpu.pipeline_mode<synchronous>, transform_indices = @transform_3, window_bounds = array<i64: 1, 128>}, {pipeline_mode = #tpu.pipeline_mode<synchronous>, transform_indices = @transform_4, window_bounds = array<i64: 1, 128>}, {pipeline_mode = #tpu.pipeline_mode<synchronous>, transform_indices = @transform_5, window_bounds = array<i64: 128, 384>}, {pipeline_mode = #tpu.pipeline_mode<synchronous>, transform_indices = @transform_6, window_bounds = array<i64: 128, 256>}, {pipeline_mode = #tpu.pipeline_mode<synchronous>, transform_indices = @transform_7, window_bounds = array<i64: 128, 128>}, {pipeline_mode = #tpu.pipeline_mode<synchronous>, transform_indices = @transform_8, window_bounds = array<i64: 1, 128>}, {transform_indices = @transform_9, window_bounds = array<i64: 8, 8, 128>}]} {
    %c0 = arith.constant 0 : index
    %c0_0 = arith.constant 0 : index
    %0 = vector.load %arg4[%c0, %c0_0] : memref<1x128xf32, #tpu.memory_space<vmem>>, vector<1x128xf32>
    %c0_1 = arith.constant 0 : index
    %c0_2 = arith.constant 0 : index
    %1 = vector.load %arg5[%c0_1, %c0_2] : memref<1x128xf32, #tpu.memory_space<vmem>>, vector<1x128xf32>
    %c0_3 = arith.constant 0 : index
    %c0_4 = arith.constant 0 : index
    %c0_5 = arith.constant 0 : index
    %2 = vector.load %arg1[%c0_3, %c0_4, %c0_5] : memref<8x8x128xf32, #tpu.memory_space<vmem>>, vector<8x8x128xf32>
    %c0_6 = arith.constant 0 : index
    %c0_7 = arith.constant 0 : index
    %3 = vector.load %arg3[%c0_6, %c0_7] : memref<16x128xf32, #tpu.memory_space<vmem>>, vector<8x128xf32>
    %4 = vector.shape_cast %3 : vector<8x128xf32> to vector<1x8x128xf32>
    %5 = vector.broadcast %4 : vector<1x8x128xf32> to vector<8x8x128xf32>
    %6 = arith.addf %2, %5 : vector<8x8x128xf32>
    %c0_8 = arith.constant 0 : index
    %c0_9 = arith.constant 0 : index
    %c0_10 = arith.constant 0 : index
    %7 = vector.load %arg2[%c0_8, %c0_9, %c0_10] : memref<8x8x128xf32, #tpu.memory_space<vmem>>, vector<8x8x128xf32>
    %c8 = arith.constant 8 : index
    %c0_11 = arith.constant 0 : index
    %8 = vector.load %arg3[%c8, %c0_11] : memref<16x128xf32, #tpu.memory_space<vmem>>, vector<8x128xf32>
    %9 = vector.shape_cast %8 : vector<8x128xf32> to vector<1x8x128xf32>
    %10 = vector.broadcast %9 : vector<1x8x128xf32> to vector<8x8x128xf32>
    %11 = arith.addf %7, %10 : vector<8x8x128xf32>
    %cst = arith.constant dense<0.000000e+00> : vector<8x8xf32>
    %12 = vector.multi_reduction <add>, %6, %cst [2] : vector<8x8x128xf32> to vector<8x8xf32>
    %13 = vector.shape_cast %12 : vector<8x8xf32> to vector<8x8x1xf32>
    %cst_12 = arith.constant 3.125000e-02 : f32
    %14 = vector.broadcast %cst_12 : f32 to vector<8x8x1xf32>
    %15 = arith.mulf %13, %14 : vector<8x8x1xf32>
    %16 = arith.mulf %6, %6 : vector<8x8x128xf32>
    %cst_13 = arith.constant dense<0.000000e+00> : vector<8x8xf32>
    %17 = vector.multi_reduction <add>, %16, %cst_13 [2] : vector<8x8x128xf32> to vector<8x8xf32>
    %18 = vector.shape_cast %17 : vector<8x8xf32> to vector<8x8x1xf32>
    %cst_14 = arith.constant 3.125000e-02 : f32
    %19 = vector.broadcast %cst_14 : f32 to vector<8x8x1xf32>
    %20 = arith.mulf %18, %19 : vector<8x8x1xf32>
    %21 = arith.mulf %15, %15 : vector<8x8x1xf32>
    %22 = arith.subf %20, %21 : vector<8x8x1xf32>
    %cst_15 = arith.constant 0.000000e+00 : f32
    %23 = vector.broadcast %cst_15 : f32 to vector<8x8x1xf32>
    %24 = arith.maximumf %22, %23 : vector<8x8x1xf32>
    %25 = vector.broadcast %15 : vector<8x8x1xf32> to vector<8x8x128xf32>
    %26 = arith.subf %6, %25 : vector<8x8x128xf32>
    %cst_16 = arith.constant 9.99999974E-6 : f32
    %27 = vector.broadcast %cst_16 : f32 to vector<8x8x1xf32>
    %28 = arith.addf %24, %27 : vector<8x8x1xf32>
    %29 = math.rsqrt %28 : vector<8x8x1xf32>
    %30 = vector.broadcast %29 : vector<8x8x1xf32> to vector<8x8x128xf32>
    %31 = arith.mulf %26, %30 : vector<8x8x128xf32>
    %32 = vector.shape_cast %0 : vector<1x128xf32> to vector<1x1x128xf32>
    %33 = vector.broadcast %32 : vector<1x1x128xf32> to vector<8x8x128xf32>
    %34 = arith.mulf %31, %33 : vector<8x8x128xf32>
    %35 = vector.shape_cast %1 : vector<1x128xf32> to vector<1x1x128xf32>
    %36 = vector.broadcast %35 : vector<1x1x128xf32> to vector<8x8x128xf32>
    %37 = arith.addf %34, %36 : vector<8x8x128xf32>
    %38 = vector.shape_cast %37 : vector<8x8x128xf32> to vector<64x128xf32>
    %39 = arith.truncf %38 : vector<64x128xf32> to vector<64x128xbf16>
    %cst_17 = arith.constant dense<0.000000e+00> : vector<8x8xf32>
    %40 = vector.multi_reduction <add>, %11, %cst_17 [2] : vector<8x8x128xf32> to vector<8x8xf32>
    %41 = vector.shape_cast %40 : vector<8x8xf32> to vector<8x8x1xf32>
    %cst_18 = arith.constant 3.125000e-02 : f32
    %42 = vector.broadcast %cst_18 : f32 to vector<8x8x1xf32>
    %43 = arith.mulf %41, %42 : vector<8x8x1xf32>
    %44 = arith.mulf %11, %11 : vector<8x8x128xf32>
    %cst_19 = arith.constant dense<0.000000e+00> : vector<8x8xf32>
    %45 = vector.multi_reduction <add>, %44, %cst_19 [2] : vector<8x8x128xf32> to vector<8x8xf32>
    %46 = vector.shape_cast %45 : vector<8x8xf32> to vector<8x8x1xf32>
    %cst_20 = arith.constant 3.125000e-02 : f32
    %47 = vector.broadcast %cst_20 : f32 to vector<8x8x1xf32>
    %48 = arith.mulf %46, %47 : vector<8x8x1xf32>
    %49 = arith.mulf %43, %43 : vector<8x8x1xf32>
    %50 = arith.subf %48, %49 : vector<8x8x1xf32>
    %cst_21 = arith.constant 0.000000e+00 : f32
    %51 = vector.broadcast %cst_21 : f32 to vector<8x8x1xf32>
    %52 = arith.maximumf %50, %51 : vector<8x8x1xf32>
    %53 = vector.broadcast %43 : vector<8x8x1xf32> to vector<8x8x128xf32>
    %54 = arith.subf %11, %53 : vector<8x8x128xf32>
    %cst_22 = arith.constant 9.99999974E-6 : f32
    %55 = vector.broadcast %cst_22 : f32 to vector<8x8x1xf32>
    %56 = arith.addf %52, %55 : vector<8x8x1xf32>
    %57 = math.rsqrt %56 : vector<8x8x1xf32>
    %58 = vector.broadcast %57 : vector<8x8x1xf32> to vector<8x8x128xf32>
    %59 = arith.mulf %54, %58 : vector<8x8x128xf32>
    %60 = vector.shape_cast %0 : vector<1x128xf32> to vector<1x1x128xf32>
    %61 = vector.broadcast %60 : vector<1x1x128xf32> to vector<8x8x128xf32>
    %62 = arith.mulf %59, %61 : vector<8x8x128xf32>
    %63 = vector.shape_cast %1 : vector<1x128xf32> to vector<1x1x128xf32>
    %64 = vector.broadcast %63 : vector<1x1x128xf32> to vector<8x8x128xf32>
    %65 = arith.addf %62, %64 : vector<8x8x128xf32>
    %66 = vector.shape_cast %65 : vector<8x8x128xf32> to vector<64x128xf32>
    %67 = arith.truncf %66 : vector<64x128xf32> to vector<64x128xbf16>
    %c0_23 = arith.constant 0 : index
    %c0_24 = arith.constant 0 : index
    %68 = vector.load %arg6[%c0_23, %c0_24] : memref<128x384xbf16, #tpu.memory_space<vmem>>, vector<128x384xbf16>
    %cst_25 = arith.constant dense<0.000000e+00> : vector<64x384xf32>
    %69 = tpu.matmul %39, %68, %cst_25 {dimension_numbers = #tpu.dot_dimension_numbers<[1], [0], [0], [1], [0, 0, 1, 1], [], []>} : vector<64x128xbf16>, vector<128x384xbf16>, vector<64x384xf32> -> vector<64x384xf32>
    %c0_26 = arith.constant 0 : index
    %c0_27 = arith.constant 0 : index
    %70 = vector.load %arg7[%c0_26, %c0_27] : memref<128x256xbf16, #tpu.memory_space<vmem>>, vector<128x256xbf16>
    %cst_28 = arith.constant dense<0.000000e+00> : vector<64x256xf32>
    %71 = tpu.matmul %67, %70, %cst_28 {dimension_numbers = #tpu.dot_dimension_numbers<[1], [0], [0], [1], [0, 0, 1, 1], [], []>} : vector<64x128xbf16>, vector<128x256xbf16>, vector<64x256xf32> -> vector<64x256xf32>
    %72 = vector.extract_strided_slice %69 {offsets = [0, 0], sizes = [64, 128], strides = [1, 1]} : vector<64x384xf32> to vector<64x128xf32>
    %73 = vector.shape_cast %72 : vector<64x128xf32> to vector<8x8x128xf32>
    %74 = vector.extract_strided_slice %69 {offsets = [0, 128], sizes = [64, 128], strides = [1, 1]} : vector<64x384xf32> to vector<64x128xf32>
    %75 = vector.shape_cast %74 : vector<64x128xf32> to vector<8x8x128xf32>
    %76 = vector.extract_strided_slice %69 {offsets = [0, 256], sizes = [64, 128], strides = [1, 1]} : vector<64x384xf32> to vector<64x128xf32>
    %77 = vector.shape_cast %76 : vector<64x128xf32> to vector<8x8x128xf32>
    %78 = vector.extract_strided_slice %71 {offsets = [0, 0], sizes = [64, 128], strides = [1, 1]} : vector<64x256xf32> to vector<64x128xf32>
    %79 = vector.shape_cast %78 : vector<64x128xf32> to vector<8x8x128xf32>
    %80 = vector.extract_strided_slice %71 {offsets = [0, 128], sizes = [64, 128], strides = [1, 1]} : vector<64x256xf32> to vector<64x128xf32>
    %81 = vector.shape_cast %80 : vector<64x128xf32> to vector<8x8x128xf32>
    %82 = arith.truncf %73 : vector<8x8x128xf32> to vector<8x8x128xbf16>
    %83 = arith.truncf %75 : vector<8x8x128xf32> to vector<8x8x128xbf16>
    "tpu.trace_start"() <{level = 10 : i32, message = "bqd,bkd->bqk"}> : () -> ()
    %cst_29 = arith.constant dense<0.000000e+00> : vector<8x8x8xf32>
    %84 = tpu.matmul %82, %83, %cst_29 {dimension_numbers = #tpu.dot_dimension_numbers<[2], [2], [1], [1], [0, 0, 0, 1, 1, 1], [0], [0]>} : vector<8x8x128xbf16>, vector<8x8x128xbf16>, vector<8x8x8xf32> -> vector<8x8x8xf32>
    "tpu.trace_stop"() : () -> ()
    %85 = arith.truncf %79 : vector<8x8x128xf32> to vector<8x8x128xbf16>
    "tpu.trace_start"() <{level = 10 : i32, message = "bqd,bkd->bqk"}> : () -> ()
    %cst_30 = arith.constant dense<0.000000e+00> : vector<8x8x8xf32>
    %86 = tpu.matmul %82, %85, %cst_30 {dimension_numbers = #tpu.dot_dimension_numbers<[2], [2], [1], [1], [0, 0, 0, 1, 1, 1], [0], [0]>} : vector<8x8x128xbf16>, vector<8x8x128xbf16>, vector<8x8x8xf32> -> vector<8x8x8xf32>
    "tpu.trace_stop"() : () -> ()
    %cst_31 = arith.constant dense<0xFF800000> : vector<8x8xf32>
    %87 = vector.multi_reduction <maximumf>, %84, %cst_31 [2] : vector<8x8x8xf32> to vector<8x8xf32>
    %88 = vector.shape_cast %87 : vector<8x8xf32> to vector<8x8x1xf32>
    %cst_32 = arith.constant dense<0xFF800000> : vector<8x8xf32>
    %89 = vector.multi_reduction <maximumf>, %86, %cst_32 [2] : vector<8x8x8xf32> to vector<8x8xf32>
    %90 = vector.shape_cast %89 : vector<8x8xf32> to vector<8x8x1xf32>
    %91 = arith.maximumf %88, %90 : vector<8x8x1xf32>
    %92 = vector.broadcast %91 : vector<8x8x1xf32> to vector<8x8x8xf32>
    %93 = arith.subf %84, %92 : vector<8x8x8xf32>
    %94 = math.exp %93 : vector<8x8x8xf32>
    %95 = vector.broadcast %91 : vector<8x8x1xf32> to vector<8x8x8xf32>
    %96 = arith.subf %86, %95 : vector<8x8x8xf32>
    %97 = math.exp %96 : vector<8x8x8xf32>
    %cst_33 = arith.constant dense<0.000000e+00> : vector<8x8xf32>
    %98 = vector.multi_reduction <add>, %94, %cst_33 [2] : vector<8x8x8xf32> to vector<8x8xf32>
    %99 = vector.shape_cast %98 : vector<8x8xf32> to vector<8x8x1xf32>
    %cst_34 = arith.constant dense<0.000000e+00> : vector<8x8xf32>
    %100 = vector.multi_reduction <add>, %97, %cst_34 [2] : vector<8x8x8xf32> to vector<8x8xf32>
    %101 = vector.shape_cast %100 : vector<8x8xf32> to vector<8x8x1xf32>
    %102 = arith.addf %99, %101 : vector<8x8x1xf32>
    %103 = arith.truncf %94 : vector<8x8x8xf32> to vector<8x8x8xbf16>
    %104 = arith.truncf %77 : vector<8x8x128xf32> to vector<8x8x128xbf16>
    "tpu.trace_start"() <{level = 10 : i32, message = "bqk,bkd->bqd"}> : () -> ()
    %cst_35 = arith.constant dense<0.000000e+00> : vector<8x8x128xf32>
    %105 = tpu.matmul %103, %104, %cst_35 {dimension_numbers = #tpu.dot_dimension_numbers<[2], [1], [1], [2], [0, 0, 0, 1, 1, 2], [0], [0]>} : vector<8x8x8xbf16>, vector<8x8x128xbf16>, vector<8x8x128xf32> -> vector<8x8x128xf32>
    "tpu.trace_stop"() : () -> ()
    %106 = arith.truncf %97 : vector<8x8x8xf32> to vector<8x8x8xbf16>
    %107 = arith.truncf %81 : vector<8x8x128xf32> to vector<8x8x128xbf16>
    "tpu.trace_start"() <{level = 10 : i32, message = "bqk,bkd->bqd"}> : () -> ()
    %cst_36 = arith.constant dense<0.000000e+00> : vector<8x8x128xf32>
    %108 = tpu.matmul %106, %107, %cst_36 {dimension_numbers = #tpu.dot_dimension_numbers<[2], [1], [1], [2], [0, 0, 0, 1, 1, 2], [0], [0]>} : vector<8x8x8xbf16>, vector<8x8x128xbf16>, vector<8x8x128xf32> -> vector<8x8x128xf32>
    "tpu.trace_stop"() : () -> ()
    %109 = arith.addf %105, %108 : vector<8x8x128xf32>
    %110 = tpu.reciprocal %102 {approx = true} : vector<8x8x1xf32> -> vector<8x8x1xf32>
    %111 = vector.broadcast %110 : vector<8x8x1xf32> to vector<8x8x128xf32>
    %112 = arith.mulf %109, %111 : vector<8x8x128xf32>
    %113 = vector.shape_cast %112 : vector<8x8x128xf32> to vector<64x128xf32>
    %114 = arith.truncf %113 : vector<64x128xf32> to vector<64x128xbf16>
    %c0_37 = arith.constant 0 : index
    %c0_38 = arith.constant 0 : index
    %115 = vector.load %arg8[%c0_37, %c0_38] : memref<128x128xbf16, #tpu.memory_space<vmem>>, vector<128x128xbf16>
    %cst_39 = arith.constant dense<0.000000e+00> : vector<64x128xf32>
    %116 = tpu.matmul %114, %115, %cst_39 {dimension_numbers = #tpu.dot_dimension_numbers<[1], [0], [0], [1], [0, 0, 1, 1], [], []>} : vector<64x128xbf16>, vector<128x128xbf16>, vector<64x128xf32> -> vector<64x128xf32>
    %c0_40 = arith.constant 0 : index
    %c0_41 = arith.constant 0 : index
    %117 = vector.load %arg9[%c0_40, %c0_41] : memref<1x128xf32, #tpu.memory_space<vmem>>, vector<1x128xf32>
    %118 = vector.broadcast %117 : vector<1x128xf32> to vector<64x128xf32>
    %119 = arith.addf %116, %118 : vector<64x128xf32>
    %120 = vector.shape_cast %119 : vector<64x128xf32> to vector<8x8x128xf32>
    %c0_42 = arith.constant 0 : index
    %c0_43 = arith.constant 0 : index
    %c0_44 = arith.constant 0 : index
    %121 = vector.load %arg10[%c0_42, %c0_43, %c0_44] : memref<8x8x128xf32, #tpu.memory_space<vmem>>, vector<8x8x128xf32>
    tpu.vector_store %arg10[%c0_42, %c0_43, %c0_44], %120 {strides = array<i32>} : memref<8x8x128xf32, #tpu.memory_space<vmem>>, vector<8x8x128xf32>,
    return
  }
  func.func @transform_0(%arg0: i32) -> (i32, i32, i32) {
    %c0_i32 = arith.constant 0 : i32
    %c0_i32_0 = arith.constant 0 : i32
    %c0_i32_1 = arith.constant 0 : i32
    return %arg0, %c0_i32, %c0_i32_0 : i32, i32, i32
  }
  func.func @transform_1(%arg0: i32) -> (i32, i32, i32) {
    %c0_i32 = arith.constant 0 : i32
    %c0_i32_0 = arith.constant 0 : i32
    %c0_i32_1 = arith.constant 0 : i32
    return %arg0, %c0_i32, %c0_i32_0 : i32, i32, i32
  }
  func.func @transform_2(%arg0: i32) -> (i32, i32) {
    %c0_i32 = arith.constant 0 : i32
    %c0_i32_0 = arith.constant 0 : i32
    %c0_i32_1 = arith.constant 0 : i32
    return %c0_i32, %c0_i32_0 : i32, i32
  }
  func.func @transform_3(%arg0: i32) -> (i32, i32) {
    %c0_i32 = arith.constant 0 : i32
    %c0_i32_0 = arith.constant 0 : i32
    %c0_i32_1 = arith.constant 0 : i32
    return %c0_i32, %c0_i32_0 : i32, i32
  }
  func.func @transform_4(%arg0: i32) -> (i32, i32) {
    %c0_i32 = arith.constant 0 : i32
    %c0_i32_0 = arith.constant 0 : i32
    %c0_i32_1 = arith.constant 0 : i32
    return %c0_i32, %c0_i32_0 : i32, i32
  }
  func.func @transform_5(%arg0: i32) -> (i32, i32) {
    %c0_i32 = arith.constant 0 : i32
    %c0_i32_0 = arith.constant 0 : i32
    %c0_i32_1 = arith.constant 0 : i32
    return %c0_i32, %c0_i32_0 : i32, i32
  }
  func.func @transform_6(%arg0: i32) -> (i32, i32) {
    %c0_i32 = arith.constant 0 : i32
    %c0_i32_0 = arith.constant 0 : i32
    %c0_i32_1 = arith.constant 0 : i32
    return %c0_i32, %c0_i32_0 : i32, i32
  }
  func.func @transform_7(%arg0: i32) -> (i32, i32) {
    %c0_i32 = arith.constant 0 : i32
    %c0_i32_0 = arith.constant 0 : i32
    %c0_i32_1 = arith.constant 0 : i32
    return %c0_i32, %c0_i32_0 : i32, i32
  }
  func.func @transform_8(%arg0: i32) -> (i32, i32) {
    %c0_i32 = arith.constant 0 : i32
    %c0_i32_0 = arith.constant 0 : i32
    %c0_i32_1 = arith.constant 0 : i32
    return %c0_i32, %c0_i32_0 : i32, i32
  }
  func.func @transform_9(%arg0: i32) -> (i32, i32, i32) {
    %c0_i32 = arith.constant 0 : i32
    %c0_i32_0 = arith.constant 0 : i32
    %c0_i32_1 = arith.constant 0 : i32
    return %arg0, %c0_i32, %c0_i32_0 : i32, i32, i32
  }
}

</mosaic_0001>

<bundles_post_ra>
// kernel: fwd.5
= control target key start
LH: loop header
LB: loop body
LE: loop exit
PB: predicated region body
PF: predicated region fallthrough
CT: control target
= control target key end

     0   :  { %s2077_s12 = smov 0   ;;  %s2528_s0 = inlined_call_operand.vmem [shape: f32[2,8,8,128], index: 0, kind: input, shape index: {}]   ;;  %s2529_s1 = inlined_call_operand.vmem [shape: bf16[3,384,128], index: 1, kind: input, shape index: {}]   ;;  %s2530_s2 = inlined_call_operand.vmem [shape: f32[1,128], index: 2, kind: input, shape index: {}]   ;;  %s2531_s3 = inlined_call_operand.vmem [shape: f32[2,8,8,128], index: 3, kind: output, shape index: {}]  }
   0x1 LB: > { %s1490_s13 = sadd.s32 4294967295, %s2054_s12   ;;  %p1494_p0 = scmp.ge.s32.totalorder %s2054_s12, 1  ;;  %s2054_s12 = sphi %s2077_s12, %s13_s12  }
   0x2   : > { %p137_p1 = scmp.lt.s32.totalorder %s2054_s12, 3 }
   0x4   : > { %p138_p2 = pnand %p1494_p0, %p137_p1 }
   0x5   : > { %v1976_v0 = vld [vmem:[%s2529_s1 + $0x100] sm:$0xff] (!%p138_p2)   ;;  %v1979_v3 = vld [vmem:[%s2529_s1 + $0x108] sm:$0xff] (!%p138_p2)   ;;  %v1982_v6 = vld [vmem:[%s2529_s1 + $0x110] sm:$0xff] (!%p138_p2)   ;;  %p161_p3 = scmp.lt.s32.totalorder (!%p138_p2), %s1490_s13, 1  ;;  %vm252_vm0 = vcmask (!%p138_p2), 1040384   ;;  %vm263_vm1 = vcmask (!%p138_p2), 1044480  }
   0x6   : > { %141 = sbr.rel (%p138_p2) target bundleno = 352 (0x160), region = 32  ;;  %v1977_v1 = vld [vmem:[%s2529_s1 + $0x140] sm:$0xff] (!%p138_p2)   ;;  %1699 = vmatprep.subr.bf16.mxu0 (!%p138_p2), %v1976_v0  ;;  %v1980_v4 = vld [vmem:[%s2529_s1 + $0x148] sm:$0xff] (!%p138_p2)   ;;  %v1983_v7 = vld [vmem:[%s2529_s1 + $0x150] sm:$0xff] (!%p138_p2)   ;;  %vm253_vm2 = vsmask.f32 (!%p138_p2), 256 }
   0x7   : > { %v1978_v2 = vld [vmem:[%s2529_s1 + $0xc0] sm:$0xff] (!%p138_p2)   ;;  %1855 = vmatprep.subr.bf16.mxu1 (!%p138_p2), %v1977_v1  ;;  %v1981_v5 = vld [vmem:[%s2529_s1 + $0xc8] sm:$0xff] (!%p138_p2)   ;;  %v1984_v8 = vld [vmem:[%s2529_s1 + $0xd0] sm:$0xff] (!%p138_p2)   ;;  %vm264_vm3 = vsmask.f32 (!%p138_p2), 4352 }
   0x8   : > { %1700 = vmatpush3.bf16.msra.mxu0 (!%p138_p2), %v1978_v2  ;;  %1856 = vmatpush3.bf16.msra.mxu1 (!%p138_p2), %v1977_v1  ;;  %v1985_v9 = vld [vmem:[%s2529_s1 + $0x118] sm:$0xff] (!%p138_p2)   ;;  %v1988_v12 = vld [vmem:[%s2529_s1 + $0x120] sm:$0xff] (!%p138_p2)   ;;  %v1991_v15 = vld [vmem:[%s2529_s1 + $0x128] sm:$0xff] (!%p138_p2)  }
   0x9   : > { %1701 = vmatprep.subr.bf16.mxu0 (!%p138_p2), %v1979_v3  ;;  %1857 = vmatprep.subr.bf16.mxu1 (!%p138_p2), %v1980_v4  ;;  %v1986_v10 = vld [vmem:[%s2529_s1 + $0x158] sm:$0xff] (!%p138_p2)   ;;  %v1989_v13 = vld [vmem:[%s2529_s1 + $0x160] sm:$0xff] (!%p138_p2)   ;;  %v1992_v16 = vld [vmem:[%s2529_s1 + $0x168] sm:$0xff] (!%p138_p2)  }
   0xa   : > { %v1987_v11 = vld [vmem:[%s2529_s1 + $0xd8] sm:$0xff] (!%p138_p2)   ;;  %v1990_v14 = vld [vmem:[%s2529_s1 + $0xe0] sm:$0xff] (!%p138_p2)   ;;  %v1993_v17 = vld [vmem:[%s2529_s1 + $0xe8] sm:$0xff] (!%p138_p2)  }
   0xb   : > { %v1994_v18 = vld [vmem:[%s2529_s1 + $0x130] sm:$0xff] (!%p138_p2)   ;;  %v1997_v21 = vld [vmem:[%s2529_s1 + $0x138] sm:$0xff] (!%p138_p2)   ;;  %v2000_v34 = vld [vmem:[%s2529_s1 + $0x40] sm:$0xff] (!%p138_p2)  }
   0xc   : > { %1702 = vmatpush3.bf16.msra.mxu0 (!%p138_p2), %v1981_v5  ;;  %1858 = vmatpush3.bf16.msra.mxu1 (!%p138_p2), %v1980_v4  ;;  %v1995_v19 = vld [vmem:[%s2529_s1 + $0x170] sm:$0xff] (!%p138_p2)   ;;  %v1998_v24 = vld [vmem:[%s2529_s1 + $0x178] sm:$0xff] (!%p138_p2)   ;;  %v2180_v37 = vld [vmem:[%s2529_s1 + $0x80] sm:$0xff] (!%p138_p2)  }
   0xd   : > { %1703 = vmatprep.subr.bf16.mxu0 %v1982_v6  ;;  %1859 = vmatprep.subr.bf16.mxu1 %v1983_v7  ;;  %s2537_s13 = smov (!%p161_p3, %s1490_s13), 1  ;;  %v1996_v20 = vld [vmem:[%s2529_s1 + $0xf0] sm:$0xff]   ;;  %v1999_v28 = vld [vmem:[%s2529_s1 + $0xf8] sm:$0xff]   ;;  %vm2185_vm4 = vmand %vm252_vm0, %vm253_vm2 }
   0xe   : > { %s1697_s23 = sshll.u32 %s2537_s13, 6  ;;  %vm2191_vm5 = vmand %vm263_vm1, %vm264_vm3  ;;  %v2019_v46 = vld [vmem:[%s2529_s1 + $0xb0] sm:$0xff]  }
   0xf   : > { %s2157_s5 = scalar_lea.vmem %s2528_s0, %s1697_s23  ;;  %s2515_s20 = scalar_lea.vmem %s2531_s3, %s1697_s23 }
  0x10   : > { %1704 = vmatpush3.bf16.msra.mxu0 %v1984_v8  ;;  %1860 = vmatpush3.bf16.msra.mxu1 %v1983_v7  ;;  %v172_v22 = vld [vmem:[%s2157_s5] sm:$0xff]  ;;  %v173_v23 = vld [vmem:[%s2157_s5 + $0x8] sm:$0xff]  ;;  %v174_v27 = vld [vmem:[%s2157_s5 + $0x10] sm:$0xff] }
  0x11   : > { %1705 = vmatprep.subr.bf16.mxu0 %v1985_v9  ;;  %1861 = vmatprep.subr.bf16.mxu1 %v1986_v10  ;;  %v180_v25 = vpack.c.bf16 %v172_v22, %v172_v22  ;;  %v181_v26 = vpack.c.bf16 %v173_v23, %v173_v23  ;;  %v182_v29 = vpack.c.bf16 %v174_v27, %v174_v27  ;;  %v175_v38 = vld [vmem:[%s2157_s5 + $0x18] sm:$0xff]  ;;  %v2004_v22 = vld [vmem:[%s2529_s1 + $0x88] sm:$0xff]  }
  0x12   : > { %v183_v41 = vpack.c.bf16 %v175_v38, %v175_v38 }
  0x13   : > { %v189_v30 = vshrl.u32 %v180_v25, 16  ;;  %v192_v31 = vshll.u32 %v180_v25, 16  ;;  %v196_v32 = vshrl.u32 %v181_v26, 16  ;;  %v199_v33 = vshll.u32 %v181_v26, 16  ;;  %v2005_v26 = vld [vmem:[%s2529_s1 + $0x8] sm:$0xff]  }
  0x14   : > { %1706 = vmatpush3.bf16.msra.mxu0 %v1987_v11  ;;  %1862 = vmatpush3.bf16.msra.mxu1 %v1986_v10  ;;  %v203_v35 = vshrl.u32 %v182_v29, 16  ;;  %v206_v36 = vshll.u32 %v182_v29, 16  ;;  %v210_v47 = vshrl.u32 %v183_v41, 16  ;;  %v213_v52 = vshll.u32 %v183_v41, 16  ;;  %v2002_v11 = vld [vmem:[%s2529_s1] sm:$0xff]   ;;  %v178_v41 = vld [vmem:[%s2157_s5 + $0x30] sm:$0xff] }
  0x15   : > { %1707 = vmatprep.subr.bf16.mxu0 %v1988_v12  ;;  %1863 = vmatprep.subr.bf16.mxu1 %v1989_v13  ;;  %v191_v39 = vrot.slane %v189_v30, 7  ;;  %v198_v40 = vrot.slane %v196_v32, 7  ;;  %v2003_v12 = vld [vmem:[%s2529_s1 + $0x48] sm:$0xff]   ;;  %v2006_v32 = vld [vmem:[%s2529_s1 + $0x50] sm:$0xff]  }
  0x16   : > { %v205_v43 = vrot.slane %v203_v35, 7  ;;  %v212_v51 = vrot.slane %v210_v47, 7  ;;  %v2007_v35 = vld [vmem:[%s2529_s1 + $0x90] sm:$0xff]   ;;  %v2009_v47 = vld [vmem:[%s2529_s1 + $0x58] sm:$0xff]  }
  0x17   : > { %v194_v44 = vor.u32 %v192_v31, %v191_v39  ;;  %v201_v45 = vor.u32 %v199_v33, %v198_v40 }
  0x18   : > { %1708 = vmatpush3.bf16.msra.mxu0 %v1990_v14  ;;  %1864 = vmatpush3.bf16.msra.mxu1 %v1989_v13  ;;  %v208_v48 = vor.u32 %v206_v36, %v205_v43  ;;  %v215_v1 = vor.u32 %v213_v52, %v212_v51  ;;  %v179_v43 = vld [vmem:[%s2157_s5 + $0x38] sm:$0xff] }
  0x19   : > { %1709 = vmatprep.subr.bf16.mxu0 %v1991_v15  ;;  %1865 = vmatprep.subr.bf16.mxu1 %v1992_v16  ;;  %v255_v49 = vsel %vm2185_vm4, 0, %v194_v44  ;;  %v256_v50 = vsel %vm2185_vm4, 0, %v201_v45  ;;  %v2056_v44 = vmov 0   ;;  %v2010_v51 = vld [vmem:[%s2529_s1 + $0x98] sm:$0xff]  }
  0x1a   : > { %v2202_v53 = vsel %vm2191_vm5, %v255_v49, 0  ;;  %v2206_v54 = vsel %vm2191_vm5, %v256_v50, 0  ;;  %v257_v55 = vsel %vm2185_vm4, 0, %v208_v48  ;;  %v258_v7 = vsel %vm2185_vm4, 0, %v215_v1  ;;  %v2011_v52 = vld [vmem:[%s2529_s1 + $0x18] sm:$0xff]  }
  0x1b   : > { %v282_v56 = vshrl.u32 %v2202_v53, 16  ;;  %v284_v57 = vshll.u32 %v2202_v53, 16  ;;  %v289_v58 = vshrl.u32 %v2206_v54, 16  ;;  %v291_v59 = vshll.u32 %v2206_v54, 16 }
  0x1c   : > { %1710 = vmatpush3.bf16.msra.mxu0 %v1993_v17  ;;  %1866 = vmatpush3.bf16.msra.mxu1 %v1992_v16  ;;  %v2216_v60 = vsel %vm2191_vm5, %v257_v55, 0  ;;  %v339_v61 = vrot.slane %v2202_v53, 1  ;;  %v340_v62 = vrot.slane %v2206_v54, 1  ;;  %v1547_v9 = vcombine.low %v2202_v53, %v2206_v54 }
  0x1d   : > { %1711 = vmatprep.subr.bf16.mxu0 %v1994_v18  ;;  %1867 = vmatprep.subr.bf16.mxu1 %v1995_v19  ;;  %v286_v63 = vrot.slane %v284_v57, 1  ;;  %v293_v0 = vrot.slane %v291_v59, 1  ;;  %v341_v2 = vrot.slane %v2216_v60, 1  ;;  %v298_v4 = vshll.u32 %v2216_v60, 16  ;;  %v176_v18 = vld [vmem:[%s2157_s5 + $0x20] sm:$0xff] }
  0x1e   : > { %v1549_v3 = vcombine.low %v339_v61, %v340_v62  ;;  %v296_v8 = vshrl.u32 %v2216_v60, 16  ;;  %v2237_v10 = vsel %vm2191_vm5, %v258_v7, 0  ;;  %v2283_v45 = vrot.slane %v2056_v44, 1 }
  0x1f   : > { %v2226_v5 = vor.u32 %v286_v63, %v282_v56  ;;  %v2228_v6 = vor.u32 %v293_v0, %v289_v58  ;;  %v300_v13 = vrot.slane %v298_v4, 1  ;;  %v342_v15 = vrot.slane %v2237_v10, 1 }
  0x20   : > { %1712 = vmatpush3.bf16.msra.mxu0 %v1996_v20  ;;  %1868 = vmatpush3.bf16.msra.mxu1 %v1995_v19  ;;  %v303_v16 = vshrl.u32 %v2237_v10, 16  ;;  %v305_v17 = vshll.u32 %v2237_v10, 16  ;;  %v177_v19 = vld [vmem:[%s2157_s5 + $0x28] sm:$0xff]  ;;  %v184_v20 = vpack.c.bf16 %v176_v18, %v176_v18  ;;  %v1550_v38 = vcombine.low %v2216_v60, %v2237_v10  ;;  %v2014_v18 = vld [vmem:[%s2529_s1 + $0x20] sm:$0xff]  }
  0x21   : > { %1713 = vmatprep.subr.bf16.mxu0 %v1997_v21  ;;  %1869 = vmatprep.subr.bf16.mxu1 %v1998_v24  ;;  %v1548_v14 = vcombine.low %v2226_v5, %v2228_v6  ;;  %v1552_v21 = vcombine.low %v341_v2, %v342_v15  ;;  %v2259_v23 = vor.u32 %v300_v13, %v296_v8  ;;  %v2013_v13 = vld [vmem:[%s2529_s1 + $0xa0] sm:$0xff]  }
  0x22   : > { %1871 = vmatprep.mubr.bf16.mxu1 %v1549_v3  ;;  %v185_v25 = vpack.c.bf16 %v177_v19, %v177_v19  ;;  %v217_v27 = vshrl.u32 %v184_v20, 16  ;;  %v186_v49 = vpack.c.bf16 %v178_v41, %v178_v41  ;;  %v187_v50 = vpack.c.bf16 %v179_v43, %v179_v43  ;;  %v2012_v3 = vld [vmem:[%s2529_s1 + $0x60] sm:$0xff]  }
  0x23   : > { %679 = vmatprep.mubr.bf16.mxu0 %v1548_v14 }
  0x24   : > { %1714 = vmatpush3.bf16.msra.mxu0 %v1999_v28  ;;  %1870 = vmatpush3.bf16.msra.mxu1 %v1998_v24  ;;  %v307_v24 = vrot.slane %v305_v17, 1  ;;  %v220_v28 = vshll.u32 %v184_v20, 16  ;;  %v224_v30 = vshrl.u32 %v185_v25, 16  ;;  %v227_v31 = vshll.u32 %v185_v25, 16  ;;  %v2015_v25 = vld [vmem:[%s2529_s1 + $0x68] sm:$0xff]  }
  0x25   : > { %1751 = vmatprep.subr.bf16.mxu0 %v2000_v34  ;;  %1879 = vmatprep.subr.bf16.mxu1 %v2180_v37  ;;  %v219_v33 = vrot.slane %v217_v27, 7  ;;  %v231_v63 = vshrl.u32 %v186_v49, 16  ;;  %v234_v4 = vshll.u32 %v186_v49, 16  ;;  %v1585_v49 = vcombine.low %v2283_v45, %v339_v61  ;;  %v2021_v61 = vld [vmem:[%s2529_s1 + $0x78] sm:$0xff]  }
  0x26   : > { %v2264_v29 = vor.u32 %v307_v24, %v303_v16  ;;  %v226_v36 = vrot.slane %v224_v30, 7  ;;  %v2016_v30 = vld [vmem:[%s2529_s1 + $0xa8] sm:$0xff]  }
  0x27   : > { %680 = vmatmul.mubr.bf16.vlgmr.msra.gmra.mrb[0].mxu0 %v1547_v9  ;;  %1872 = vmatmul.mubr.bf16.vlgmr.msra.gmra.mrb[0].mxu1 %v1552_v21  ;;  %v222_v39 = vor.u32 %v220_v28, %v219_v33  ;;  %v233_v8 = vrot.slane %v231_v63, 7  ;;  %v238_v9 = vshrl.u32 %v187_v50, 16  ;;  %v1584_v63 = vcombine.low %v2283_v45, %v2226_v5 }
  0x28   : > { %1752 = vmatpush3.bf16.msra.mxu0 %v2002_v11  ;;  %1880 = vmatpush3.bf16.msra.mxu1 %v2180_v37  ;;  %v1551_v34 = vcombine.low %v2259_v23, %v2264_v29  ;;  %v2008_v37 = vld [vmem:[%s2529_s1 + $0x10] sm:$0xff]   ;;  %v229_v40 = vor.u32 %v227_v31, %v226_v36  ;;  %v241_v11 = vshll.u32 %v187_v50, 16  ;;  %v1588_v5 = vcombine.low %v340_v62, %v341_v2  ;;  %v2026_v62 = vld [vmem:[%s2529_s1 + $0x180] sm:$0xff]  }
  0x29   : > { %1753 = vmatprep.subr.bf16.mxu0 %v2003_v12  ;;  %1881 = vmatprep.subr.bf16.mxu1 %v2004_v22  ;;  %v259_v48 = vsel %vm2185_vm4, 0, %v222_v39  ;;  %v236_v19 = vor.u32 %v234_v4, %v233_v8  ;;  %v240_v20 = vrot.slane %v238_v9, 7  ;;  %v2028_v8 = vld [vmem:[%s2529_s1 + $0x208] sm:$0xff]   ;;  %v2423_v2 = vcombine.low %v2228_v6, %v2259_v23  ;;  %v2030_v23 = vld [vmem:[%s2529_s1 + $0x1d0] sm:$0xff]  }
  0x2a   : > { %687 = vmatprep.mubr.bf16.mxu0 %v1551_v34  ;;  %v260_v55 = vsel %vm2185_vm4, 0, %v229_v40  ;;  %v2300_v56 = vsel %vm2191_vm5, %v259_v48, 0  ;;  %v2018_v40 = vld [vmem:[%s2529_s1 + $0x70] sm:$0xff]   ;;  %v2029_v6 = vld [vmem:[%s2529_s1 + $0x188] sm:$0xff]   ;;  %v1586_v9 = vcombine.low %v2206_v54, %v2216_v60  ;;  %v2037_v54 = vld [vmem:[%s2529_s1 + $0x220] sm:$0xff]  }
  0x2b   : > { %v2304_v57 = vsel %vm2191_vm5, %v260_v55, 0  ;;  %v310_v58 = vshrl.u32 %v2300_v56, 16  ;;  %v312_v59 = vshll.u32 %v2300_v56, 16  ;;  %v343_v14 = vrot.slane %v2300_v56, 1  ;;  %v2035_v60 = vld [vmem:[%s2529_s1 + $0x198] sm:$0xff]  }
  0x2c   : > { %1754 = vmatpush3.bf16.msra.mxu0 %v2005_v26  ;;  %1882 = vmatpush3.bf16.msra.mxu1 %v2004_v22  ;;  %v317_v0 = vshrl.u32 %v2304_v57, 16  ;;  %v319_v1 = vshll.u32 %v2304_v57, 16  ;;  %v344_v16 = vrot.slane %v2304_v57, 1  ;;  %v1553_v24 = vcombine.low %v2300_v56, %v2304_v57 }
  0x2d   : > { %1755 = vmatprep.subr.bf16.mxu0 %v2006_v32  ;;  %1883 = vmatprep.subr.bf16.mxu1 %v2007_v35  ;;  %v314_v7 = vrot.slane %v312_v59, 1  ;;  %v243_v26 = vor.u32 %v241_v11, %v240_v20  ;;  %v261_v27 = vsel %vm2185_vm4, 0, %v236_v19  ;;  %v2017_v32 = vld [vmem:[%s2529_s1 + $0x28] sm:$0xff]   ;;  %v2022_v59 = vld [vmem:[%s2529_s1 + $0xb8] sm:$0xff]   ;;  %v2411_v4 = vcombine.low %v342_v15, %v343_v14 }
  0x2e   : > { %v321_v12 = vrot.slane %v319_v1, 1  ;;  %v1555_v22 = vcombine.low %v343_v14, %v344_v16  ;;  %v2343_v31 = vsel %vm2191_vm5, %v261_v27, 0  ;;  %v2024_v1 = vld [vmem:[%s2529_s1 + $0x1c0] sm:$0xff]   ;;  %v2027_v15 = vld [vmem:[%s2529_s1 + $0x1c8] sm:$0xff]   ;;  %v2034_v11 = vld [vmem:[%s2529_s1 + $0x218] sm:$0xff]  }
  0x2f   : > { %688 = vmatmul.mubr.bf16.gmra.mrb[4].mxu0 %v1550_v38  ;;  %v2318_v17 = vor.u32 %v314_v7, %v310_v58  ;;  %v262_v33 = vsel %vm2185_vm4, 0, %v243_v26  ;;  %v324_v34 = vshrl.u32 %v2343_v31, 16  ;;  %v345_v38 = vrot.slane %v2343_v31, 1  ;;  %v2033_v14 = vld [vmem:[%s2529_s1 + $0x1d8] sm:$0xff]   ;;  %v2039_v20 = vld [vmem:[%s2529_s1 + $0x1e8] sm:$0xff]  }
  0x30   : > { %1756 = vmatpush3.bf16.msra.mxu0 %v2008_v37  ;;  %1884 = vmatpush3.bf16.msra.mxu1 %v2007_v35  ;;  %v2323_v21 = vor.u32 %v321_v12, %v317_v0  ;;  %v326_v35 = vshll.u32 %v2343_v31, 16  ;;  %v2354_v36 = vsel %vm2191_vm5, %v262_v33, 0  ;;  %v2023_v0 = vld [vmem:[%s2529_s1 + $0x38] sm:$0xff]   ;;  %v1583_v7 = vcombine.low %v2056_v44, %v2202_v53  ;;  %v2031_v53 = vld [vmem:[%s2529_s1 + $0x210] sm:$0xff]  }
  0x31   : > { %1757 = vmatprep.subr.bf16.mxu0 %v2009_v47  ;;  %1885 = vmatprep.subr.bf16.mxu1 %v2010_v51  ;;  %v419_v39 = vshrl.u32 %v2354_v36, 16  ;;  %v421_v42 = vshll.u32 %v2354_v36, 16  ;;  %v426_v41 = vrot.slane %v2354_v36, 1  ;;  %v2368_v43 = vcombine.low %v2354_v36, %v2056_v44  ;;  %v2032_v12 = vld [vmem:[%s2529_s1 + $0x190] sm:$0xff]   ;;  %v2045_v26 = vld [vmem:[%s2529_s1 + $0x1f8] sm:$0xff]  }
  0x32   : > { %v1554_v28 = vcombine.low %v2318_v17, %v2323_v21  ;;  %1875 = vmatprep.mubr.bf16.mxu1 %v1555_v22  ;;  %v328_v37 = vrot.slane %v326_v35, 1  ;;  %v1556_v55 = vcombine.low %v2343_v31, %v2354_v36  ;;  %v1594_v44 = vcombine.low %v344_v16, %v345_v38 }
  0x33   : > { %v423_v48 = vrot.slane %v421_v42, 1  ;;  %v1558_v50 = vcombine.low %v345_v38, %v426_v41  ;;  %v1589_v16 = vcombine.low %v2237_v10, %v2300_v56  ;;  %v2043_v10 = vld [vmem:[%s2529_s1 + $0x230] sm:$0xff]   ;;  %v2041_v56 = vld [vmem:[%s2529_s1 + $0x1a8] sm:$0xff]   ;;  %v1592_v22 = vcombine.low %v2304_v57, %v2343_v31  ;;  %v2047_v57 = vld [vmem:[%s2529_s1 + $0x1b8] sm:$0xff]  }
  0x34   : > { %1758 = vmatpush3.bf16.msra.mxu0 %v2011_v52  ;;  %1886 = vmatpush3.bf16.msra.mxu1 %v2010_v51  ;;  %v2370_v47 = vor.u32 %v328_v37, %v324_v34  ;;  %v2020_v51 = vld [vmem:[%s2529_s1 + $0x30] sm:$0xff]   ;;  %v1669_v27 = vcombine.low %v426_v41, %v2283_v45 }
  0x35   : > { %1759 = vmatprep.subr.bf16.mxu0 %v2012_v3  ;;  %1887 = vmatprep.subr.bf16.mxu1 %v2013_v13  ;;  %v2380_v52 = vor.u32 %v423_v48, %v419_v39  ;;  %v2025_v3 = vld [vmem:[%s2529_s1 + $0x200] sm:$0xff]  }
  0x36   : > { %695 = vmatprep.mubr.bf16.mxu0 %v1554_v28  ;;  %1876 = vmatmul.mubr.bf16.gmra.mrb[4].mxu1 %v1558_v50  ;;  %v1593_v19 = vcombine.low %v2323_v21, %v2370_v47  ;;  %v2042_v21 = vld [vmem:[%s2529_s1 + $0x1f0] sm:$0xff]  }
  0x37   : > { %696 = vmatmul.mubr.bf16.gmra.mrb[8].mxu0 %v1553_v24  ;;  %v1557_v58 = vcombine.low %v2370_v47, %v2380_v52  ;;  %1895 = vmatprep.mubr.bf16.mxu1 %v1585_v49  ;;  %v2046_v24 = vld [vmem:[%s2529_s1 + $0x238] sm:$0xff]   ;;  %v1668_v28 = vcombine.low %v2380_v52, %v2283_v45 }
  0x38   : > { %1760 = vmatpush3.bf16.msra.mxu0 %v2014_v18  ;;  %1888 = vmatpush3.bf16.msra.mxu1 %v2013_v13  ;;  %v1590_v13 = vcombine.low %v2264_v29, %v2318_v17  ;;  %v2036_v29 = vld [vmem:[%s2529_s1 + $0x1e0] sm:$0xff]   ;;  %v2040_v17 = vld [vmem:[%s2529_s1 + $0x228] sm:$0xff]  }
  0x39   : > { %1761 = vmatprep.subr.bf16.mxu0 %v2015_v25  ;;  %1889 = vmatprep.subr.bf16.mxu1 %v2016_v30  ;;  %v2038_v18 = vld [vmem:[%s2529_s1 + $0x1a0] sm:$0xff]   ;;  %v2044_v25 = vld [vmem:[%s2529_s1 + $0x1b0] sm:$0xff]  }
  0x3a   : > { %703 = vmatprep.mubr.bf16.mxu0 %v1557_v58 }
  0x3c   : > { %1762 = vmatpush3.bf16.msra.mxu0 %v2017_v32  ;;  %1890 = vmatpush3.bf16.msra.mxu1 %v2016_v30 }
  0x3d   : > { %1763 = vmatprep.subr.bf16.mxu0 %v2018_v40  ;;  %1891 = vmatprep.subr.bf16.mxu1 %v2019_v46 }
  0x3f   : > { %704 = vmatmul.mubr.bf16.gmra.mrb[12].mxu0 %v1556_v55 }
  0x40   : > { %1764 = vmatpush3.bf16.msra.mxu0 %v2020_v51  ;;  %1892 = vmatpush3.bf16.msra.mxu1 %v2019_v46 }
  0x41   : > { %1765 = vmatprep.subr.bf16.mxu0 %v2021_v61  ;;  %1893 = vmatprep.subr.bf16.mxu1 %v2022_v59 }
  0x42   : > { %977 = vmatprep.mubr.bf16.mxu0 %v1584_v63 }
  0x44   : > { %1766 = vmatpush3.bf16.msra.mxu0 %v2023_v0  ;;  %1894 = vmatpush3.bf16.msra.mxu1 %v2022_v59 }
  0x45   : > { %1803 = vmatprep.subr.bf16.mxu0 %v2024_v1  ;;  %1903 = vmatprep.subr.bf16.mxu1 %v2025_v3 }
  0x47   : > { %1896 = vmatmul.mubr.bf16.vlgmr.msra.gmra.mrb[0].mxu1 %v1588_v5  ;;  %978 = vmatmul.mubr.bf16.vlgmr.msra.gmra.mrb[16].mxu0 %v1583_v7 }
  0x48   : > { %1904 = vmatpush3.bf16.msra.mxu1 %v2025_v3  ;;  %1899 = vmatprep.mubr.bf16.mxu1 %v2411_v4 }
  0x49   : > { %1905 = vmatprep.subr.bf16.mxu1 %v2028_v8  ;;  %1804 = vmatpush3.bf16.msra.mxu0 %v2026_v62 }
  0x4a   : > { %985 = vmatprep.mubr.bf16.mxu0 %v2423_v2  ;;  %1805 = vmatprep.subr.bf16.mxu0 %v2027_v15 }
  0x4c   : > { %1906 = vmatpush3.bf16.msra.mxu1 %v2028_v8 }
  0x4d   : > { %1907 = vmatprep.subr.bf16.mxu1 %v2031_v53  ;;  %1806 = vmatpush3.bf16.msra.mxu0 %v2029_v6 }
  0x4e   : > { %1807 = vmatprep.subr.bf16.mxu0 %v2030_v23 }
  0x4f   : > { %1900 = vmatmul.mubr.bf16.gmra.mrb[4].mxu1 %v1594_v44  ;;  %986 = vmatmul.mubr.bf16.gmra.mrb[20].mxu0 %v1586_v9 }
  0x50   : > { %1908 = vmatpush3.bf16.msra.mxu1 %v2031_v53  ;;  %1919 = vmatprep.mubr.bf16.mxu1 %v1588_v5 }
  0x51   : > { %1909 = vmatprep.subr.bf16.mxu1 %v2034_v11  ;;  %1808 = vmatpush3.bf16.msra.mxu0 %v2032_v12 }
  0x52   : > { %993 = vmatprep.mubr.bf16.mxu0 %v1590_v13  ;;  %1809 = vmatprep.subr.bf16.mxu0 %v2033_v14 }
  0x54   : > { %1910 = vmatpush3.bf16.msra.mxu1 %v2034_v11 }
  0x55   : > { %1911 = vmatprep.subr.bf16.mxu1 %v2037_v54  ;;  %1810 = vmatpush3.bf16.msra.mxu0 %v2035_v60 }
  0x56   : > { %1811 = vmatprep.subr.bf16.mxu0 %v2036_v29 }
  0x57   : > { %994 = vmatmul.mubr.bf16.gmra.mrb[24].mxu0 %v1589_v16 }
  0x58   : > { %1912 = vmatpush3.bf16.msra.mxu1 %v2037_v54  ;;  %1001 = vmatprep.mubr.bf16.mxu0 %v1593_v19 }
  0x59   : > { %1913 = vmatprep.subr.bf16.mxu1 %v2040_v17  ;;  %1812 = vmatpush3.bf16.msra.mxu0 %v2038_v18 }
  0x5a   : > { %1813 = vmatprep.subr.bf16.mxu0 %v2039_v20 }
  0x5c   : > { %1914 = vmatpush3.bf16.msra.mxu1 %v2040_v17 }
  0x5d   : > { %1915 = vmatprep.subr.bf16.mxu1 %v2043_v10  ;;  %1814 = vmatpush3.bf16.msra.mxu0 %v2041_v56 }
  0x5e   : > { %1815 = vmatprep.subr.bf16.mxu0 %v2042_v21 }
  0x5f   : > { %1002 = vmatmul.mubr.bf16.gmra.mrb[28].mxu0 %v1592_v22 }
  0x60   : > { %1916 = vmatpush3.bf16.msra.mxu1 %v2043_v10  ;;  %1306 = vmatprep.mubr.bf16.mxu0 %v2423_v2 }
  0x61   : > { %1917 = vmatprep.subr.bf16.mxu1 %v2046_v24  ;;  %1816 = vmatpush3.bf16.msra.mxu0 %v2044_v25 }
  0x62   : > { %1817 = vmatprep.subr.bf16.mxu0 %v2045_v26 }
  0x64   : > { %1918 = vmatpush3.bf16.msra.mxu1 %v2046_v24 }
  0x65   : > { %1818 = vmatpush3.bf16.msra.mxu0 %v2047_v57 }
  0x67   : > { %1920 = vmatmul.mubr.bf16.vlgmr.msra.gmra.mrb[0].mxu1 %v2411_v4 }
  0x68   : > { %1923 = vmatprep.mubr.bf16.mxu1 %v1594_v44  ;;  %1307 = vmatmul.mubr.bf16.vlgmr.msra.gmra.mrb[32].mxu0 %v1586_v9 }
  0x69   : > { %1314 = vmatprep.mubr.bf16.mxu0 %v1590_v13 }
  0x6f   : > { %1924 = vmatmul.mubr.bf16.gmra.mrb[4].mxu1 %v1669_v27 }
  0x70   : > { %1315 = vmatmul.mubr.bf16.gmra.mrb[36].mxu0 %v1589_v16 }
  0x71   : > { %1322 = vmatprep.mubr.bf16.mxu0 %v1593_v19 }
  0x78   : > { %1323 = vmatmul.mubr.bf16.gmra.mrb[40].mxu0 %v1592_v22 }
  0x79   : > { %1330 = vmatprep.mubr.bf16.mxu0 %v1668_v28 }
  0x80   : > { %1331 = vmatmul.mubr.bf16.gmra.mrb[44].mxu0 %v2368_v43 }
  0xfa   : > { %v1715_v30 = vpop.f32.mrb[0].mxu0 }
  0xfb   : > { %v1716_v31 = vpop.f32.mrb[1].mxu0 }
  0xfc   : > { %v1717_v32 = vadd.f32 %v1716_v31, %v1715_v30  ;;  %v1718_v33 = vpop.f32.mrb[2].mxu0 }
  0xfd   : > { %v1719_v34 = vpop.f32.mrb[3].mxu0 }
  0xfe   : > { %v1720_v35 = vadd.f32 %v1719_v34, %v1718_v33  ;;  %v1694_v33 = vld [vmem:[%s2530_s2] ss:$0 sm:$0xff] }
 0x102   : > { %v1721_v38 = vpop.f32.mrb[4].mxu0 }
 0x103   : > { %v1722_v37 = vpop.f32.mrb[5].mxu0 }
 0x104   : > { %v1723_v36 = vadd.f32 %v1722_v37, %v1721_v38  ;;  %v1724_v39 = vpop.f32.mrb[6].mxu0 }
 0x105   : > { %v1725_v42 = vpop.f32.mrb[7].mxu0 }
 0x106   : > { %v1726_v40 = vadd.f32 %v1725_v42, %v1724_v39 }
 0x10a   : > { %v1727_v46 = vpop.f32.mrb[8].mxu0 }
 0x10b   : > { %v1728_v41 = vpop.f32.mrb[9].mxu0 }
 0x10c   : > { %v1729_v47 = vadd.f32 %v1728_v41, %v1727_v46  ;;  %v1730_v45 = vpop.f32.mrb[10].mxu0 }
 0x10d   : > { %v1731_v48 = vpop.f32.mrb[11].mxu0 }
 0x10e   : > { %v1732_v49 = vadd.f32 %v1731_v48, %v1730_v45 }
 0x112   : > { %v1733_v50 = vpop.f32.mrb[12].mxu0 }
 0x113   : > { %v1734_v43 = vpop.f32.mrb[13].mxu0 }
 0x114   : > { %v1735_v51 = vadd.f32 %v1734_v43, %v1733_v50  ;;  %v1736_v52 = vpop.f32.mrb[14].mxu0 }
 0x115   : > { %v1737_v55 = vpop.f32.mrb[15].mxu0 }
 0x116   : > { %v1738_v61 = vadd.f32 %v1737_v55, %v1736_v52 }
 0x11a   : > { %v1767_v58 = vpop.f32.mrb[16].mxu0 }
 0x11b   : > { %v1768_v59 = vpop.f32.mrb[17].mxu0 }
 0x11c   : > { %v1769_v63 = vadd.f32 %v1768_v59, %v1767_v58  ;;  %v1770_v0 = vpop.f32.mrb[18].mxu0 }
 0x11d   : > { %v1771_v1 = vpop.f32.mrb[19].mxu0 }
 0x11e   : > { %v1930_v3 = vadd.f32 %v1769_v63, %v1717_v32  ;;  %v1772_v5 = vadd.f32 %v1771_v1, %v1770_v0 }
 0x120   : > { %v1936_v4 = vadd.f32 %v1772_v5, %v1720_v35 }
 0x122   : > { %v1773_v7 = vpop.f32.mrb[20].mxu0 }
 0x123   : > { %v1774_v8 = vpop.f32.mrb[21].mxu0 }
 0x124   : > { %v1775_v62 = vadd.f32 %v1774_v8, %v1773_v7  ;;  %v1776_v2 = vpop.f32.mrb[22].mxu0 }
 0x125   : > { %v1777_v15 = vpop.f32.mrb[23].mxu0 }
 0x126   : > { %v1927_v53 = vadd.f32 %v1775_v62, %v1723_v36  ;;  %v1778_v6 = vadd.f32 %v1777_v15, %v1776_v2 }
 0x128   : > { %v1933_v23 = vadd.f32 %v1778_v6, %v1726_v40 }
 0x12a   : > { %v1779_v44 = vpop.f32.mrb[24].mxu0 }
 0x12b   : > { %v1780_v9 = vpop.f32.mrb[25].mxu0 }
 0x12c   : > { %v1781_v11 = vadd.f32 %v1780_v9, %v1779_v44  ;;  %v1782_v12 = vpop.f32.mrb[26].mxu0 }
 0x12d   : > { %v1783_v13 = vpop.f32.mrb[27].mxu0 }
 0x12e   : > { %v1942_v14 = vadd.f32 %v1781_v11, %v1729_v47  ;;  %v1784_v54 = vadd.f32 %v1783_v13, %v1782_v12 }
 0x130   : > { %v1948_v60 = vadd.f32 %v1784_v54, %v1732_v49 }
 0x132   : > { %v1785_v29 = vpop.f32.mrb[28].mxu0 }
 0x133   : > { %v1786_v16 = vpop.f32.mrb[29].mxu0 }
 0x134   : > { %v1787_v17 = vadd.f32 %v1786_v16, %v1785_v29  ;;  %v1788_v18 = vpop.f32.mrb[30].mxu0 }
 0x135   : > { %v1789_v19 = vpop.f32.mrb[31].mxu0 }
 0x136   : > { %v1939_v20 = vadd.f32 %v1787_v17, %v1735_v51  ;;  %v1790_v10 = vadd.f32 %v1789_v19, %v1788_v18 }
 0x138   : > { %v1945_v56 = vadd.f32 %v1790_v10, %v1738_v61 }
 0x13a   : > { %v1921_v21 = vpop.f32.mrb[0].mxu1 }
 0x13b   : > { %v1373_v22 = vpop.f32.mrb[1].mxu1  ;;  %v1819_v24 = vpop.f32.mrb[32].mxu0 }
 0x13c   : > { %v1922_v25 = vpop.f32.mrb[2].mxu1  ;;  %v1820_v26 = vpop.f32.mrb[33].mxu0 }
 0x13d   : > { %v1376_v57 = vpop.f32.mrb[3].mxu1  ;;  %v1821_v27 = vadd.f32 %v1820_v26, %v1819_v24  ;;  %v1822_v28 = vpop.f32.mrb[34].mxu0 }
 0x13e   : > { %v1823_v30 = vpop.f32.mrb[35].mxu0 }
 0x13f   : > { %v1931_v31 = vadd.f32 %v1930_v3, %v1821_v27  ;;  %v1824_v32 = vadd.f32 %v1823_v30, %v1822_v28 }
 0x141   : > { %v1932_v34 = vadd.f32 %v1931_v31, %v1373_v22  ;;  %v1937_v35 = vadd.f32 %v1936_v4, %v1824_v32 }
 0x142   : > { %v1925_v38 = vpop.f32.mrb[4].mxu1 }
 0x143   : > { %v1389_v37 = vpop.f32.mrb[5].mxu1  ;;  %v1419_v36 = vadd.f32 %v1932_v34, %v1694_v33  ;;  %v1938_v39 = vadd.f32 %v1937_v35, %v1376_v57  ;;  %v1825_v42 = vpop.f32.mrb[36].mxu0 }
 0x144   : > { %v1926_v40 = vpop.f32.mrb[6].mxu1  ;;  %v1826_v46 = vpop.f32.mrb[37].mxu0 }
 0x145   : > { %v1392_v41 = vpop.f32.mrb[7].mxu1  ;;  %1427 = vst [vmem:[%s2515_s20] sm:$0xff] %v1419_v36  ;;  %v1420_v47 = vadd.f32 %v1938_v39, %v1694_v33  ;;  %v1827_v45 = vadd.f32 %v1826_v46, %v1825_v42  ;;  %v1828_v48 = vpop.f32.mrb[38].mxu0 }
 0x146   : > { %v1829_v49 = vpop.f32.mrb[39].mxu0 }
 0x147   : > { %1428 = vst [vmem:[%s2515_s20 + $0x8] sm:$0xff] %v1420_v47  ;;  %v1928_v50 = vadd.f32 %v1927_v53, %v1827_v45  ;;  %v1830_v43 = vadd.f32 %v1829_v49, %v1828_v48 }
 0x149   : > { %v1929_v51 = vadd.f32 %v1928_v50, %v1921_v21  ;;  %v1934_v52 = vadd.f32 %v1933_v23, %v1830_v43 }
 0x14b   : > { %v1421_v55 = vadd.f32 %v1929_v51, %v1694_v33  ;;  %v1935_v61 = vadd.f32 %v1934_v52, %v1922_v25  ;;  %v1831_v58 = vpop.f32.mrb[40].mxu0 }
 0x14c   : > { %v1832_v59 = vpop.f32.mrb[41].mxu0 }
 0x14d   : > { %1429 = vst [vmem:[%s2515_s20 + $0x10] sm:$0xff] %v1421_v55  ;;  %v1422_v63 = vadd.f32 %v1935_v61, %v1694_v33  ;;  %v1833_v0 = vadd.f32 %v1832_v59, %v1831_v58  ;;  %v1834_v1 = vpop.f32.mrb[42].mxu0 }
 0x14e   : > { %v1835_v3 = vpop.f32.mrb[43].mxu0 }
 0x14f   : > { %1430 = vst [vmem:[%s2515_s20 + $0x18] sm:$0xff] %v1422_v63  ;;  %v1943_v5 = vadd.f32 %v1942_v14, %v1833_v0  ;;  %v1836_v4 = vadd.f32 %v1835_v3, %v1834_v1 }
 0x151   : > { %v1944_v7 = vadd.f32 %v1943_v5, %v1389_v37  ;;  %v1949_v8 = vadd.f32 %v1948_v60, %v1836_v4 }
 0x153   : > { %v1423_v62 = vadd.f32 %v1944_v7, %v1694_v33  ;;  %v1950_v2 = vadd.f32 %v1949_v8, %v1392_v41  ;;  %v1837_v15 = vpop.f32.mrb[44].mxu0 }
 0x154   : > { %v1838_v53 = vpop.f32.mrb[45].mxu0 }
 0x155   : > { %1431 = vst [vmem:[%s2515_s20 + $0x20] sm:$0xff] %v1423_v62  ;;  %v1424_v6 = vadd.f32 %v1950_v2, %v1694_v33  ;;  %v1839_v23 = vadd.f32 %v1838_v53, %v1837_v15  ;;  %v1840_v44 = vpop.f32.mrb[46].mxu0 }
 0x156   : > { %v1841_v9 = vpop.f32.mrb[47].mxu0 }
 0x157   : > { %1432 = vst [vmem:[%s2515_s20 + $0x28] sm:$0xff] %v1424_v6  ;;  %v1940_v11 = vadd.f32 %v1939_v20, %v1839_v23  ;;  %v1842_v12 = vadd.f32 %v1841_v9, %v1840_v44 }
 0x159   : > { %v1941_v13 = vadd.f32 %v1940_v11, %v1925_v38  ;;  %v1946_v54 = vadd.f32 %v1945_v56, %v1842_v12 }
 0x15b   : > { %v1425_v14 = vadd.f32 %v1941_v13, %v1694_v33  ;;  %v1947_v29 = vadd.f32 %v1946_v54, %v1926_v40 }
 0x15d   : > { %1433 = vst [vmem:[%s2515_s20 + $0x30] sm:$0xff] %v1425_v14  ;;  %v1426_v60 = vadd.f32 %v1947_v29, %v1694_v33 }
 0x15f   : > { %1434 = vst [vmem:[%s2515_s20 + $0x38] sm:$0xff] %v1426_v60 }
 0x160 PF: > { %s13_s12 = sadd.s32 1, %s2054_s12  }
 0x161   : > { %p10_p4 = scmp.ge.s32.totalorder %s13_s12, 4  }
 0x163   :  { %12 = sbr.rel (!%p10_p4) target bundleno = 1 (0x1), region = 64 }

// kernel: fwd.3
= control target key start
LH: loop header
LB: loop body
LE: loop exit
PB: predicated region body
PF: predicated region fallthrough
CT: control target
= control target key end

     0   :  { %s3620_s30 = smov 0   ;;  %s4399_s0 = inlined_call_operand.vmem [shape: f32[16,8,128], index: 0, kind: input, shape index: {}]   ;;  %s4400_s1 = inlined_call_operand.vmem [shape: f32[16,8,128], index: 1, kind: input, shape index: {}]   ;;  %s4401_s2 = inlined_call_operand.vmem [shape: f32[16,128], index: 2, kind: input, shape index: {}]   ;;  %s4402_s3 = inlined_call_operand.vmem [shape: f32[1,128], index: 3, kind: input, shape index: {}]   ;;  %s4403_s4 = inlined_call_operand.vmem [shape: f32[1,128], index: 4, kind: input, shape index: {}]   ;;  %s4404_s5 = inlined_call_operand.vmem [shape: bf16[128,384], index: 5, kind: input, shape index: {}]   ;;  %s4405_s6 = inlined_call_operand.vmem [shape: bf16[128,256], index: 6, kind: input, shape index: {}]   ;;  %s4406_s7 = inlined_call_operand.vmem [shape: bf16[128,128], index: 7, kind: input, shape index: {}]   ;;  %s4407_s8 = inlined_call_operand.vmem [shape: f32[1,128], index: 8, kind: input, shape index: {}]   ;;  %s4408_s9 = inlined_call_operand.vmem [shape: f32[16,8,128], index: 9, kind: output, shape index: {}]  }
   0x1 LB: > { %s2964_s10 = sadd.s32 4294967295, %s3565_s30   ;;  %p2968_p0 = scmp.ge.s32.totalorder %s3565_s30, 1  ;;  %s3565_s30 = sphi %s3620_s30, %s19_s30  }
   0x2   : > { %p299_p1 = scmp.lt.s32.totalorder %s3565_s30, 3 }
   0x4   : > { %p300_p2 = pnand %p2968_p0, %p299_p1 }
   0x5   : > { %s2969_s11 = sshll.u32 (!%p300_p2), %s2964_s10, 3  ;;  %v369_v0 = vld [vmem:[%s4401_s2] sm:$0xff] (!%p300_p2)  ;;  %v3418_v21 = vld [vmem:[%s4404_s5 + $0x1c] ss:$12 sps:$4 sm:$0xff] (!%p300_p2)   ;;  %v3424_v32 = vld [vmem:[%s4404_s5 + $0x4c] ss:$12 sps:$4 sm:$0xff] (!%p300_p2)  }
   0x6   : > { %303 = sbr.rel (%p300_p2) target bundleno = 1331 (0x533), region = 56  ;;  %p341_p3 = scmp.lt.s32.totalorder (!%p300_p2), %s2969_s11, 15  ;;  %v3415_v16 = vld [vmem:[%s4404_s5 + $0x4] ss:$12 sps:$4 sm:$0xff] (!%p300_p2)   ;;  %v3417_v18 = vld [vmem:[%s4404_s5] ss:$12 sps:$4 sm:$0xff] (!%p300_p2)  }
   0x7   : > { %831 = vmatprep.subr.bf16.mxu1 (!%p300_p2), %v3415_v16  ;;  %v3420_v23 = vld [vmem:[%s4404_s5 + $0x18] ss:$12 sps:$4 sm:$0xff] (!%p300_p2)   ;;  %v3421_v26 = vld [vmem:[%s4404_s5 + $0x34] ss:$12 sps:$4 sm:$0xff] (!%p300_p2)   ;;  %v3423_v28 = vld [vmem:[%s4404_s5 + $0x30] ss:$12 sps:$4 sm:$0xff] (!%p300_p2)  }
   0x8   : > { %832 = vmatpush1.bf16.msra.mxu1 (!%p300_p2), %v3417_v18  ;;  %v3712_v31 = vld [vmem:[%s4401_s2 + $0x8] sm:$0xff] (!%p300_p2)  ;;  %v3427_v37 = vld [vmem:[%s4404_s5 + $0x64] ss:$12 sps:$4 sm:$0xff] (!%p300_p2)   ;;  %v3433_v47 = vld [vmem:[%s4404_s5 + $0x94] ss:$12 sps:$4 sm:$0xff] (!%p300_p2)   ;;  %v3567_v60 = vmov (!%p300_p2), 0  }
   0x9   : > { %833 = vmatprep.subr.bf16.mxu1 (!%p300_p2), %v3418_v21  ;;  %v3426_v34 = vld [vmem:[%s4404_s5 + $0x48] ss:$12 sps:$4 sm:$0xff] (!%p300_p2)   ;;  %v3429_v39 = vld [vmem:[%s4404_s5 + $0x60] ss:$12 sps:$4 sm:$0xff] (!%p300_p2)   ;;  %v3432_v44 = vld [vmem:[%s4404_s5 + $0x78] ss:$12 sps:$4 sm:$0xff] (!%p300_p2)   ;;  %863 = vmatprep.mubr.bf16.mxu1 (!%p300_p2), %v3567_v60 }
   0xa   : > { %v3430_v42 = vld [vmem:[%s4404_s5 + $0x7c] ss:$12 sps:$4 sm:$0xff] (!%p300_p2)   ;;  %v3436_v52 = vld [vmem:[%s4404_s5 + $0xac] ss:$12 sps:$4 sm:$0xff] (!%p300_p2)   ;;  %1097 = vmatprep.mubr.bf16.mxu0 (!%p300_p2), %v3567_v60  ;;  %vm3569_vm0 = vmmov (!%p300_p2), 0   ;;  %vm1998_vm1 = vcmask (!%p300_p2), 1043456  }
   0xb   : > { %v3435_v49 = vld [vmem:[%s4404_s5 + $0x90] ss:$12 sps:$4 sm:$0xff] (!%p300_p2)   ;;  %v3438_v54 = vld [vmem:[%s4404_s5 + $0xa8] ss:$12 sps:$4 sm:$0xff] (!%p300_p2)   ;;  %v3440_v58 = vld [vmem:[%s4405_s6 + $0x4] ss:$8 sps:$4 sm:$0xff] (!%p300_p2)  }
   0xc   : > { %834 = vmatpush1.bf16.msra.mxu1 (!%p300_p2), %v3420_v23  ;;  %v3782_v57 = vld [vmem:[%s4404_s5 + $0x8] ss:$12 sps:$4 sm:$0xff] (!%p300_p2)   ;;  %1065 = vmatprep.subr.bf16.mxu0 (!%p300_p2), %v3440_v58  ;;  %v3454_v16 = vld [vmem:[%s4405_s6 + $0x30] ss:$8 sps:$4 sm:$0xff] (!%p300_p2)   ;;  %v3456_v18 = vld [vmem:[%s4405_s6 + $0x44] ss:$8 sps:$4 sm:$0xff] (!%p300_p2)  }
   0xd   : > { %s4410_s11 = smov (!%p341_p3, %s2969_s11), 15  ;;  %835 = vmatprep.subr.bf16.mxu1 %v3421_v26  ;;  %v3442_v61 = vld [vmem:[%s4405_s6] ss:$8 sps:$4 sm:$0xff]   ;;  %v3462_v21 = vld [vmem:[%s4405_s6 + $0x50] ss:$8 sps:$4 sm:$0xff]   ;;  %vm1802_vm2 = vcmask 64512  }
   0xe   : > { %s3631_s14 = sshll.u32 %s4410_s11, 3  ;;  %1066 = vmatpush1.bf16.msra.mxu0 %v3442_v61  ;;  %v3466_v23 = vld [vmem:[%s4405_s6 + $0x60] ss:$8 sps:$4 sm:$0xff]   ;;  %v3470_v26 = vld [vmem:[%s4405_s6 + $0x70] ss:$8 sps:$4 sm:$0xff]  }
   0xf   : > { %s3637_s17 = scalar_lea.vmem %s4399_s0, %s3631_s14  ;;  %s3700_s10 = scalar_lea.vmem %s4400_s1, %s3631_s14 }
  0x10   : > { %v361_v1 = vld [vmem:[%s3637_s17] sm:$0xff]  ;;  %v362_v2 = vld [vmem:[%s3637_s17 + $0x8] sm:$0xff]  ;;  %v363_v6 = vld [vmem:[%s3637_s17 + $0x10] sm:$0xff]  ;;  %836 = vmatpush1.bf16.msra.mxu1 %v3423_v28  ;;  %s356_s13 = scalar_lea.vmem %s4408_s9, %s3631_s14 }
  0x11   : > { %v3641_v3 = vadd.f32 %v369_v0, %v361_v1  ;;  %v3643_v4 = vadd.f32 %v369_v0, %v362_v2  ;;  %v364_v8 = vld [vmem:[%s3637_s17 + $0x18] sm:$0xff]  ;;  %v3653_v9 = vadd.f32 %v369_v0, %v363_v6  ;;  %v365_v11 = vld [vmem:[%s3637_s17 + $0x20] sm:$0xff]  ;;  %v366_v13 = vld [vmem:[%s3637_s17 + $0x28] sm:$0xff]  ;;  %837 = vmatprep.subr.bf16.mxu1 %v3424_v32 }
  0x12   : > { %v3655_v10 = vadd.f32 %v369_v0, %v364_v8  ;;  %v3665_v15 = vadd.f32 %v369_v0, %v365_v11  ;;  %v3670_v17 = vadd.f32 %v369_v0, %v366_v13  ;;  %v367_v19 = vld [vmem:[%s3637_s17 + $0x30] sm:$0xff]  ;;  %v368_v24 = vld [vmem:[%s3637_s17 + $0x38] sm:$0xff]  ;;  %v378_v30 = vld [vmem:[%s3700_s10] sm:$0xff] }
  0x13   : > { %395 = vadd.xlane.f32.xlu0 %v3641_v3  ;;  %v419_v5 = vmul.f32 %v3641_v3, %v3641_v3  ;;  %v420_v7 = vmul.f32 %v3643_v4, %v3643_v4  ;;  %v421_v12 = vmul.f32 %v3653_v9, %v3653_v9  ;;  %v3689_v25 = vadd.f32 %v369_v0, %v367_v19  ;;  %v379_v35 = vld [vmem:[%s3700_s10 + $0x8] sm:$0xff]  ;;  %v380_v41 = vld [vmem:[%s3700_s10 + $0x10] sm:$0xff]  ;;  %v381_v45 = vld [vmem:[%s3700_s10 + $0x18] sm:$0xff] }
  0x14   : > { %v422_v14 = vmul.f32 %v3655_v10, %v3655_v10  ;;  %v423_v20 = vmul.f32 %v3665_v15, %v3665_v15  ;;  %v424_v22 = vmul.f32 %v3670_v17, %v3670_v17  ;;  %v3694_v27 = vadd.f32 %v369_v0, %v368_v24  ;;  %838 = vmatpush1.bf16.msra.mxu1 %v3426_v34  ;;  %v382_v51 = vld [vmem:[%s3700_s10 + $0x20] sm:$0xff]  ;;  %v383_v55 = vld [vmem:[%s3700_s10 + $0x28] sm:$0xff]  ;;  %v384_v63 = vld [vmem:[%s3700_s10 + $0x30] sm:$0xff] }
  0x15   : > { %427 = vadd.xlane.f32.xlu1 %v419_v5  ;;  %v425_v29 = vmul.f32 %v3689_v25, %v3689_v25  ;;  %v3725_v36 = vadd.f32 %v3712_v31, %v378_v30  ;;  %v3731_v38 = vadd.f32 %v3712_v31, %v379_v35  ;;  %839 = vmatprep.subr.bf16.mxu1 %v3427_v37  ;;  %v3444_v0 = vld [vmem:[%s4405_s6 + $0x14] ss:$8 sps:$4 sm:$0xff]   ;;  %v3446_v2 = vld [vmem:[%s4405_s6 + $0x10] ss:$8 sps:$4 sm:$0xff]   ;;  %v3450_v11 = vld [vmem:[%s4405_s6 + $0x20] ss:$8 sps:$4 sm:$0xff]  }
  0x16   : > { %v426_v33 = vmul.f32 %v3694_v27, %v3694_v27  ;;  %v3751_v46 = vadd.f32 %v3712_v31, %v380_v41  ;;  %v3757_v48 = vadd.f32 %v3712_v31, %v381_v45  ;;  %v3777_v56 = vadd.f32 %v3712_v31, %v382_v51  ;;  %v385_v5 = vld [vmem:[%s3700_s10 + $0x38] sm:$0xff]  ;;  %1067 = vmatprep.subr.bf16.mxu0 %v3444_v0  ;;  %v3458_v19 = vld [vmem:[%s4405_s6 + $0x40] ss:$8 sps:$4 sm:$0xff]  }
  0x17   : > { %397 = vadd.xlane.f32.xlu0 %v3643_v4  ;;  %v563_v40 = vmul.f32 %v3725_v36, %v3725_v36  ;;  %v564_v43 = vmul.f32 %v3731_v38, %v3731_v38  ;;  %v3788_v59 = vadd.f32 %v3712_v31, %v383_v55  ;;  %v3811_v6 = vadd.f32 %v3712_v31, %v384_v63  ;;  %v3452_v13 = vld [vmem:[%s4405_s6 + $0x34] ss:$8 sps:$4 sm:$0xff]  }
  0x18   : > { %840 = vmatpush1.bf16.msra.mxu1 %v3429_v39  ;;  %v565_v50 = vmul.f32 %v3751_v46, %v3751_v46  ;;  %v566_v53 = vmul.f32 %v3757_v48, %v3757_v48  ;;  %v567_v62 = vmul.f32 %v3777_v56, %v3777_v56  ;;  %1068 = vmatpush1.bf16.msra.mxu0 %v3446_v2  ;;  %v3468_v24 = vld [vmem:[%s4405_s6 + $0x74] ss:$8 sps:$4 sm:$0xff]  }
  0x19   : > { %429 = vadd.xlane.f32.xlu1 %v420_v7  ;;  %841 = vmatprep.subr.bf16.mxu1 %v3430_v42  ;;  %v568_v1 = vmul.f32 %v3788_v59, %v3788_v59  ;;  %v3448_v7 = vld [vmem:[%s4405_s6 + $0x24] ss:$8 sps:$4 sm:$0xff]   ;;  %v3817_v8 = vadd.f32 %v3712_v31, %v385_v5 }
  0x1a   : > { %1069 = vmatprep.subr.bf16.mxu0 %v3448_v7 }
  0x1b   : > { %399 = vadd.xlane.f32.xlu0 %v3653_v9 }
  0x1c   : > { %842 = vmatpush1.bf16.msra.mxu1 %v3432_v44  ;;  %1070 = vmatpush1.bf16.msra.mxu0 %v3450_v11 }
  0x1d   : > { %401 = vadd.xlane.f32.xlu1 %v3655_v10  ;;  %843 = vmatprep.subr.bf16.mxu1 %v3433_v47 }
  0x1e   : > { %1071 = vmatprep.subr.bf16.mxu0 %v3452_v13 }
  0x1f   : > { %431 = vadd.xlane.f32.xlu0 %v421_v12  ;;  %v569_v12 = vmul.f32 %v3811_v6, %v3811_v6 }
  0x20   : > { %844 = vmatpush1.bf16.msra.mxu1 %v3435_v49  ;;  %1072 = vmatpush1.bf16.msra.mxu0 %v3454_v16 }
  0x21   : > { %433 = vadd.xlane.f32.xlu1 %v422_v14  ;;  %845 = vmatprep.subr.bf16.mxu1 %v3436_v52  ;;  %v570_v14 = vmul.f32 %v3817_v8, %v3817_v8 }
  0x22   : > { %1073 = vmatprep.subr.bf16.mxu0 %v3456_v18 }
  0x23   : > { %403 = vadd.xlane.f32.xlu0 %v3665_v15 }
  0x24   : > { %846 = vmatpush1.bf16.msra.mxu1 %v3438_v54  ;;  %1074 = vmatpush1.bf16.msra.mxu0 %v3458_v19 }
  0x25   : > { %405 = vadd.xlane.f32.xlu1 %v3670_v17  ;;  %3132 = vmatprep.subr.bf16.mxu1 %v3782_v57 }
  0x27   : > { %435 = vadd.xlane.f32.xlu0 %v423_v20  ;;  %v3460_v20 = vld [vmem:[%s4405_s6 + $0x54] ss:$8 sps:$4 sm:$0xff]  }
  0x28   : > { %1075 = vmatprep.subr.bf16.mxu0 %v3460_v20 }
  0x29   : > { %437 = vadd.xlane.f32.xlu1 %v424_v22  ;;  %1076 = vmatpush1.bf16.msra.mxu0 %v3462_v21  ;;  %v3464_v22 = vld [vmem:[%s4405_s6 + $0x64] ss:$8 sps:$4 sm:$0xff]  }
  0x2a   : > { %1077 = vmatprep.subr.bf16.mxu0 %v3464_v22 }
  0x2b   : > { %407 = vadd.xlane.f32.xlu0 %v3689_v25 }
  0x2d   : > { %409 = vadd.xlane.f32.xlu1 %v3694_v27  ;;  %1078 = vmatpush1.bf16.msra.mxu0 %v3466_v23 }
  0x2e   : > { %1079 = vmatprep.subr.bf16.mxu0 %v3468_v24 }
  0x2f   : > { %439 = vadd.xlane.f32.xlu0 %v425_v29 }
  0x31   : > { %441 = vadd.xlane.f32.xlu1 %v426_v33  ;;  %1080 = vmatpush1.bf16.msra.mxu0 %v3470_v26 }
  0x33   : > { %539 = vadd.xlane.f32.xlu0 %v3725_v36 }
  0x35   : > { %541 = vadd.xlane.f32.xlu1 %v3731_v38 }
  0x37   : > { %571 = vadd.xlane.f32.xlu0 %v563_v40 }
  0x39   : > { %573 = vadd.xlane.f32.xlu1 %v564_v43 }
  0x3b   : > { %543 = vadd.xlane.f32.xlu0 %v3751_v46 }
  0x3d   : > { %545 = vadd.xlane.f32.xlu1 %v3757_v48 }
  0x3f   : > { %575 = vadd.xlane.f32.xlu0 %v565_v50 }
  0x41   : > { %577 = vadd.xlane.f32.xlu1 %v566_v53 }
  0x43   : > { %547 = vadd.xlane.f32.xlu0 %v3777_v56 }
  0x45   : > { %549 = vadd.xlane.f32.xlu1 %v3788_v59 }
  0x47   : > { %579 = vadd.xlane.f32.xlu0 %v567_v62 }
  0x49   : > { %581 = vadd.xlane.f32.xlu1 %v568_v1 }
  0x4b   : > { %551 = vadd.xlane.f32.xlu0 %v3811_v6 }
  0x4d   : > { %553 = vadd.xlane.f32.xlu1 %v3817_v8 }
  0x4f   : > { %583 = vadd.xlane.f32.xlu0 %v569_v12 }
  0x51   : > { %585 = vadd.xlane.f32.xlu1 %v570_v14 }
  0xa0   : > { %v396_v28 = vpop.xlane.xlu0 %395 }
  0xa1   : > { %v411_v29 = vmul.f32 0.03125, %v396_v28  ;;  %v3878_v28 = vld [vmem:[%s4402_s3] ss:$0 sm:$0xff] }
  0xa2   : > { %v428_v30 = vpop.xlane.xlu1 %427 }
  0xa3   : > { %v451_v31 = vmul.f32 %v411_v29, %v411_v29  ;;  %v443_v32 = vmul.f32 0.03125, %v428_v30  ;;  %v475_v13 = vsub.f32 %v3641_v3, %v411_v29 }
  0xa4   : > { %v398_v33 = vpop.xlane.xlu0 %397 }
  0xa5   : > { %v459_v34 = vsub.f32 %v443_v32, %v451_v31  ;;  %v412_v35 = vmul.f32 0.03125, %v398_v33 }
  0xa6   : > { %v430_v37 = vpop.xlane.xlu1 %429 }
  0xa7   : > { %v467_v39 = vmax.f32 %v459_v34, 0.0  ;;  %v452_v40 = vmul.f32 %v412_v35, %v412_v35  ;;  %v444_v41 = vmul.f32 0.03125, %v430_v37  ;;  %v476_v3 = vsub.f32 %v3643_v4, %v412_v35 }
  0xa8   : > { %v400_v42 = vpop.xlane.xlu0 %399 }
  0xa9   : > { %v483_v43 = vadd.f32 1e-05, %v467_v39  ;;  %v460_v44 = vsub.f32 %v444_v41, %v452_v40  ;;  %v3858_v45 = vmul.f32 0.03125, %v400_v42 }
  0xaa   : > { %v402_v47 = vpop.xlane.xlu1 %401 }
  0xab   : > { %3479 = vrsqrt.f32 %v483_v43  ;;  %v468_v49 = vmax.f32 %v460_v44, 0.0  ;;  %v453_v50 = vmul.f32 %v3858_v45, %v3858_v45  ;;  %v3862_v51 = vmul.f32 0.03125, %v402_v47  ;;  %v3889_v43 = vld [vmem:[%s4403_s4] ss:$0 sm:$0xff] }
  0xac   : > { %v432_v52 = vpop.xlane.xlu0 %431 }
  0xad   : > { %v484_v53 = vadd.f32 1e-05, %v468_v49  ;;  %v445_v54 = vmul.f32 0.03125, %v432_v52  ;;  %v454_v55 = vmul.f32 %v3862_v51, %v3862_v51 }
  0xae   : > { %v434_v58 = vpop.xlane.xlu1 %433 }
  0xaf   : > { %3481 = vrsqrt.f32 %v484_v53  ;;  %v461_v61 = vsub.f32 %v445_v54, %v453_v50  ;;  %v446_v62 = vmul.f32 0.03125, %v434_v58  ;;  %v477_v50 = vsub.f32 %v3653_v9, %v3858_v45  ;;  %v3443_v9 = vld [vmem:[%s4404_s5 + $0x20] ss:$12 sps:$4 sm:$0xff]  }
  0xb0   : > { %v404_v63 = vpop.xlane.xlu0 %403 }
  0xb1   : > { %v469_v0 = vmax.f32 %v461_v61, 0.0  ;;  %v462_v1 = vsub.f32 %v446_v62, %v454_v55  ;;  %v3866_v2 = vmul.f32 0.03125, %v404_v63  ;;  %v478_v63 = vsub.f32 %v3655_v10, %v3862_v51 }
  0xb2   : > { %v406_v5 = vpop.xlane.xlu1 %405 }
  0xb3   : > { %v485_v7 = vadd.f32 1e-05, %v469_v0  ;;  %v470_v11 = vmax.f32 %v462_v1, 0.0  ;;  %v455_v12 = vmul.f32 %v3866_v2, %v3866_v2  ;;  %v3871_v14 = vmul.f32 0.03125, %v406_v5 }
  0xb4   : > { %v436_v16 = vpop.xlane.xlu0 %435 }
  0xb5   : > { %v3480_v18 = vpop.eup %3479  ;;  %3483 = vrsqrt.f32 %v485_v7  ;;  %v486_v19 = vadd.f32 1e-05, %v470_v11  ;;  %v447_v20 = vmul.f32 0.03125, %v436_v16  ;;  %v456_v21 = vmul.f32 %v3871_v14, %v3871_v14 }
  0xb6   : > { %v438_v22 = vpop.xlane.xlu1 %437  ;;  %v499_v23 = vmul.f32 %v3480_v18, %v475_v13 }
  0xb7   : > { %3485 = vrsqrt.f32 %v486_v19  ;;  %v463_v24 = vsub.f32 %v447_v20, %v455_v12  ;;  %v448_v26 = vmul.f32 0.03125, %v438_v22 }
  0xb8   : > { %v408_v29 = vpop.xlane.xlu0 %407  ;;  %v513_v39 = vmul.f32 %v3878_v28, %v499_v23  ;;  %v3447_v23 = vld [vmem:[%s4404_s5 + $0x38] ss:$12 sps:$4 sm:$0xff]  }
  0xb9   : > { %v3482_v30 = vpop.eup %3481  ;;  %v471_v31 = vmax.f32 %v463_v24, 0.0  ;;  %v464_v32 = vsub.f32 %v448_v26, %v456_v21  ;;  %v3881_v33 = vmul.f32 0.03125, %v408_v29 }
  0xba   : > { %v410_v34 = vpop.xlane.xlu1 %409  ;;  %v500_v37 = vmul.f32 %v3482_v30, %v476_v3  ;;  %v527_v54 = vadd.f32 %v3889_v43, %v513_v39  ;;  %v479_v3 = vsub.f32 %v3665_v15, %v3866_v2  ;;  %v480_v39 = vsub.f32 %v3670_v17, %v3871_v14  ;;  %v3451_v2 = vld [vmem:[%s4404_s5 + $0x50] ss:$12 sps:$4 sm:$0xff]  }
  0xbb   : > { %v487_v40 = vadd.f32 1e-05, %v471_v31  ;;  %v472_v41 = vmax.f32 %v464_v32, 0.0  ;;  %v457_v42 = vmul.f32 %v3881_v33, %v3881_v33  ;;  %v3891_v4 = vmul.f32 0.03125, %v410_v34 }
  0xbc   : > { %v440_v35 = vpop.xlane.xlu0 %439  ;;  %v514_v44 = vmul.f32 %v3878_v28, %v500_v37 }
  0xbd   : > { %3487 = vrsqrt.f32 %v487_v40  ;;  %v488_v47 = vadd.f32 1e-05, %v472_v41  ;;  %v449_v49 = vmul.f32 0.03125, %v440_v35  ;;  %v458_v52 = vmul.f32 %v3891_v4, %v3891_v4 }
  0xbe   : > { %v442_v53 = vpop.xlane.xlu1 %441  ;;  %v528_v55 = vadd.f32 %v3889_v43, %v514_v44 }
  0xbf   : > { %v3484_v58 = vpop.eup %3483  ;;  %3489 = vrsqrt.f32 %v488_v47  ;;  %v465_v61 = vsub.f32 %v449_v49, %v457_v42  ;;  %v450_v62 = vmul.f32 0.03125, %v442_v53 }
  0xc0   : > { %v3902_v0 = vpack.c.bf16 %v528_v55, %v527_v54  ;;  %v540_v1 = vpop.xlane.xlu0 %539  ;;  %v501_v45 = vmul.f32 %v3484_v58, %v477_v50  ;;  %v481_v54 = vsub.f32 %v3689_v25, %v3881_v33 }
  0xc1   : > { %v3486_v5 = vpop.eup %3485  ;;  %v473_v7 = vmax.f32 %v465_v61, 0.0  ;;  %v466_v11 = vsub.f32 %v450_v62, %v458_v52  ;;  %v3907_v12 = vmul.f32 0.03125, %v540_v1  ;;  %v3455_v62 = vld [vmem:[%s4404_s5 + $0x68] ss:$12 sps:$4 sm:$0xff]  }
  0xc2   : > { %864 = vmatmul.mubr.bf16.vlgmr.msra.gmra.mrb[0].mxu1 %v3902_v0  ;;  %v542_v13 = vpop.xlane.xlu1 %541  ;;  %v502_v16 = vmul.f32 %v3486_v5, %v478_v63  ;;  %v515_v18 = vmul.f32 %v3878_v28, %v501_v45 }
  0xc3   : > { %v489_v10 = vadd.f32 1e-05, %v473_v7  ;;  %v474_v51 = vmax.f32 %v466_v11, 0.0  ;;  %v595_v19 = vmul.f32 %v3907_v12, %v3907_v12  ;;  %3133 = vmatpush3.bf16.msra.mxu1 %v3782_v57  ;;  %873 = vmatprep.mubr.bf16.mxu1 %v3567_v60  ;;  %v3915_v20 = vmul.f32 0.03125, %v542_v13 }
  0xc4   : > { %3134 = vmatprep.subr.bf16.mxu1 %v3443_v9  ;;  %v572_v21 = vpop.xlane.xlu0 %571  ;;  %v516_v22 = vmul.f32 %v3878_v28, %v502_v16  ;;  %v529_v30 = vadd.f32 %v3889_v43, %v515_v18  ;;  %v482_v13 = vsub.f32 %v3694_v27, %v3891_v4 }
  0xc5   : > { %3491 = vrsqrt.f32 %v489_v10  ;;  %v490_v24 = vadd.f32 1e-05, %v474_v51  ;;  %v587_v26 = vmul.f32 0.03125, %v572_v21  ;;  %v596_v57 = vmul.f32 %v3915_v20, %v3915_v20  ;;  %v3459_v10 = vld [vmem:[%s4404_s5 + $0x80] ss:$12 sps:$4 sm:$0xff]  }
  0xc6   : > { %v574_v29 = vpop.xlane.xlu1 %573  ;;  %v530_v31 = vadd.f32 %v3889_v43, %v516_v22 }
  0xc7   : > { %v3488_v32 = vpop.eup %3487  ;;  %3493 = vrsqrt.f32 %v490_v24  ;;  %v603_v34 = vsub.f32 %v587_v26, %v595_v19  ;;  %3135 = vmatpush3.bf16.msra.mxu1 %v3443_v9  ;;  %v588_v37 = vmul.f32 0.03125, %v574_v29  ;;  %v619_v29 = vsub.f32 %v3725_v36, %v3907_v12 }
  0xc8   : > { %v3929_v40 = vpack.c.bf16 %v530_v31, %v529_v30  ;;  %3136 = vmatprep.subr.bf16.mxu1 %v3447_v23  ;;  %v544_v15 = vpop.xlane.xlu0 %543  ;;  %v503_v41 = vmul.f32 %v3488_v32, %v479_v3 }
  0xc9   : > { %v3490_v42 = vpop.eup %3489  ;;  %v611_v35 = vmax.f32 %v603_v34, 0.0  ;;  %v604_v44 = vsub.f32 %v588_v37, %v596_v57  ;;  %v3934_v47 = vmul.f32 0.03125, %v544_v15  ;;  %v3463_v34 = vld [vmem:[%s4404_s5 + $0x98] ss:$12 sps:$4 sm:$0xff]  }
  0xca   : > { %874 = vmatmul.mubr.bf16.gmra.mrb[4].mxu1 %v3929_v40  ;;  %v546_v49 = vpop.xlane.xlu1 %545  ;;  %v504_v50 = vmul.f32 %v3490_v42, %v480_v39  ;;  %v517_v17 = vmul.f32 %v3878_v28, %v503_v41 }
  0xcb   : > { %v627_v14 = vadd.f32 1e-05, %v611_v35  ;;  %v612_v52 = vmax.f32 %v604_v44, 0.0  ;;  %v597_v53 = vmul.f32 %v3934_v47, %v3934_v47  ;;  %3137 = vmatpush3.bf16.msra.mxu1 %v3447_v23  ;;  %883 = vmatprep.mubr.bf16.mxu1 %v3567_v60  ;;  %v3943_v55 = vmul.f32 0.03125, %v546_v49 }
  0xcc   : > { %3138 = vmatprep.subr.bf16.mxu1 %v3451_v2  ;;  %v576_v58 = vpop.xlane.xlu0 %575  ;;  %v518_v61 = vmul.f32 %v3878_v28, %v504_v50  ;;  %v531_v5 = vadd.f32 %v3889_v43, %v517_v17  ;;  %v620_v44 = vsub.f32 %v3731_v38, %v3915_v20  ;;  %v3467_v17 = vld [vmem:[%s4404_s5 + $0xb0] ss:$12 sps:$4 sm:$0xff]  }
  0xcd   : > { %3495 = vrsqrt.f32 %v627_v14  ;;  %v628_v63 = vadd.f32 1e-05, %v612_v52  ;;  %v589_v1 = vmul.f32 0.03125, %v576_v58  ;;  %v598_v9 = vmul.f32 %v3943_v55, %v3943_v55 }
  0xce   : > { %v578_v45 = vpop.xlane.xlu1 %577  ;;  %v532_v25 = vadd.f32 %v3889_v43, %v518_v61 }
  0xcf   : > { %v3492_v33 = vpop.eup %3491  ;;  %3497 = vrsqrt.f32 %v628_v63  ;;  %v605_v7 = vsub.f32 %v589_v1, %v597_v53  ;;  %3139 = vmatpush3.bf16.msra.mxu1 %v3451_v2  ;;  %v590_v11 = vmul.f32 0.03125, %v578_v45 }
  0xd0   : > { %v3955_v16 = vpack.c.bf16 %v532_v25, %v531_v5  ;;  %3140 = vmatprep.subr.bf16.mxu1 %v3455_v62  ;;  %v548_v18 = vpop.xlane.xlu0 %547  ;;  %v505_v51 = vmul.f32 %v3492_v33, %v481_v54 }
  0xd1   : > { %v3494_v19 = vpop.eup %3493  ;;  %v613_v21 = vmax.f32 %v605_v7, 0.0  ;;  %v606_v22 = vsub.f32 %v590_v11, %v598_v9  ;;  %v3960_v23 = vmul.f32 0.03125, %v548_v18  ;;  %v621_v9 = vsub.f32 %v3751_v46, %v3934_v47 }
  0xd2   : > { %884 = vmatmul.mubr.bf16.gmra.mrb[8].mxu1 %v3955_v16  ;;  %v550_v24 = vpop.xlane.xlu1 %549  ;;  %v506_v26 = vmul.f32 %v3494_v19, %v482_v13  ;;  %v519_v27 = vmul.f32 %v3878_v28, %v505_v51  ;;  %v622_v46 = vsub.f32 %v3757_v48, %v3943_v55 }
  0xd3   : > { %v629_v4 = vadd.f32 1e-05, %v613_v21  ;;  %v614_v3 = vmax.f32 %v606_v22, 0.0  ;;  %v599_v57 = vmul.f32 %v3960_v23, %v3960_v23  ;;  %3141 = vmatpush3.bf16.msra.mxu1 %v3455_v62  ;;  %893 = vmatprep.mubr.bf16.mxu1 %v3567_v60  ;;  %v3969_v30 = vmul.f32 0.03125, %v550_v24 }
  0xd4   : > { %3142 = vmatprep.subr.bf16.mxu1 %v3459_v10  ;;  %v580_v31 = vpop.xlane.xlu0 %579  ;;  %v520_v32 = vmul.f32 %v3878_v28, %v506_v26  ;;  %v533_v41 = vadd.f32 %v3889_v43, %v519_v27  ;;  %v623_v48 = vsub.f32 %v3777_v56, %v3960_v23 }
  0xd5   : > { %3499 = vrsqrt.f32 %v629_v4  ;;  %v630_v37 = vadd.f32 1e-05, %v614_v3  ;;  %v591_v39 = vmul.f32 0.03125, %v580_v31  ;;  %v600_v15 = vmul.f32 %v3969_v30, %v3969_v30 }
  0xd6   : > { %v582_v2 = vpop.xlane.xlu1 %581  ;;  %v534_v36 = vadd.f32 %v3889_v43, %v520_v32 }
  0xd7   : > { %v3496_v12 = vpop.eup %3495  ;;  %3501 = vrsqrt.f32 %v630_v37  ;;  %v607_v42 = vsub.f32 %v591_v39, %v599_v57  ;;  %3143 = vmatpush3.bf16.msra.mxu1 %v3459_v10  ;;  %v592_v35 = vmul.f32 0.03125, %v582_v2 }
  0xd8   : > { %v538_v49 = vpack.c.bf16 %v534_v36, %v533_v41  ;;  %3144 = vmatprep.subr.bf16.mxu1 %v3463_v34  ;;  %v552_v50 = vpop.xlane.xlu0 %551  ;;  %v643_v14 = vmul.f32 %v3496_v12, %v619_v29 }
  0xd9   : > { %v3498_v52 = vpop.eup %3497  ;;  %v615_v53 = vmax.f32 %v607_v42, 0.0  ;;  %v608_v54 = vsub.f32 %v592_v35, %v600_v15  ;;  %v3984_v58 = vmul.f32 0.03125, %v552_v50 }
  0xda   : > { %894 = vmatmul.mubr.bf16.gmra.mrb[12].mxu1 %v538_v49  ;;  %v554_v61 = vpop.xlane.xlu1 %553  ;;  %v644_v62 = vmul.f32 %v3498_v52, %v620_v44  ;;  %v651_v63 = vmul.f32 %v3878_v28, %v643_v14  ;;  %v3568_v52 = vmov 0.0  }
  0xdb   : > { %v631_v1 = vadd.f32 1e-05, %v615_v53  ;;  %v616_v38 = vmax.f32 %v608_v54, 0.0  ;;  %v601_v20 = vmul.f32 %v3984_v58, %v3984_v58  ;;  %3145 = vmatpush3.bf16.msra.mxu1 %v3463_v34  ;;  %3148 = vmatprep.mubr.bf16.mxu1 %v3902_v0  ;;  %v562_v45 = vmul.f32 0.03125, %v554_v61 }
  0xdc   : > { %3146 = vmatprep.subr.bf16.mxu1 %v3467_v17  ;;  %v584_v5 = vpop.xlane.xlu0 %583  ;;  %v652_v25 = vmul.f32 %v3878_v28, %v644_v62  ;;  %v659_v18 = vadd.f32 %v3889_v43, %v651_v63  ;;  %v624_v34 = vsub.f32 %v3788_v59, %v3969_v30  ;;  %v625_v23 = vsub.f32 %v3811_v6, %v3984_v58 }
  0xdd   : > { %3503 = vrsqrt.f32 %v631_v1  ;;  %v632_v33 = vadd.f32 1e-05, %v616_v38  ;;  %v593_v7 = vmul.f32 0.03125, %v584_v5  ;;  %v602_v11 = vmul.f32 %v562_v45, %v562_v45  ;;  %3156 = vmatprep.subr.bf16.mxu0 %v3568_v52 }
  0xde   : > { %v586_v13 = vpop.xlane.xlu1 %585  ;;  %v660_v10 = vadd.f32 %v3889_v43, %v652_v25  ;;  %v626_v30 = vsub.f32 %v3817_v8, %v562_v45 }
  0xdf   : > { %v3500_v51 = vpop.eup %3499  ;;  %3505 = vrsqrt.f32 %v632_v33  ;;  %v609_v0 = vsub.f32 %v593_v7, %v601_v20  ;;  %3147 = vmatpush3.bf16.msra.mxu1 %v3467_v17  ;;  %v594_v19 = vmul.f32 0.03125, %v586_v13 }
  0xe0   : > { %v667_v47 = vpack.c.bf16 %v660_v10, %v659_v18  ;;  %v645_v21 = vmul.f32 %v3500_v51, %v621_v9  ;;  %3162 = vmatprep.subr.bf16.mxu1 %v3568_v52 }
  0xe1   : > { %v3502_v22 = vpop.eup %3501  ;;  %v617_v24 = vmax.f32 %v609_v0, 0.0  ;;  %v610_v26 = vsub.f32 %v594_v19, %v602_v11 }
  0xe2   : > { %3149 = vmatmul.mubr.bf16.vlgmr.msra.gmra.mrb[16].mxu1 %v3929_v40  ;;  %1098 = vmatmul.mubr.bf16.vlgmr.msra.gmra.mrb[0].mxu0 %v667_v47  ;;  %v646_v27 = vmul.f32 %v3502_v22, %v622_v46  ;;  %v653_v4 = vmul.f32 %v3878_v28, %v645_v21 }
  0xe3   : > { %v633_v3 = vadd.f32 1e-05, %v617_v24  ;;  %v618_v57 = vmax.f32 %v610_v26, 0.0  ;;  %3152 = vmatprep.mubr.bf16.mxu1 %v3955_v16  ;;  %1107 = vmatprep.mubr.bf16.mxu0 %v3567_v60 }
  0xe4   : > { %v654_v55 = vmul.f32 %v3878_v28, %v646_v27  ;;  %v661_v31 = vadd.f32 %v3889_v43, %v653_v4 }
  0xe5   : > { %3507 = vrsqrt.f32 %v633_v3  ;;  %v634_v29 = vadd.f32 1e-05, %v618_v57 }
  0xe6   : > { %v662_v40 = vadd.f32 %v3889_v43, %v654_v55 }
  0xe7   : > { %v3504_v32 = vpop.eup %3503  ;;  %3509 = vrsqrt.f32 %v634_v29 }
  0xe8   : > { %v668_v37 = vpack.c.bf16 %v662_v40, %v661_v31  ;;  %v647_v16 = vmul.f32 %v3504_v32, %v623_v48 }
  0xe9   : > { %v3506_v39 = vpop.eup %3505 }
  0xea   : > { %3153 = vmatmul.mubr.bf16.gmra.mrb[20].mxu1 %v538_v49  ;;  %1108 = vmatmul.mubr.bf16.gmra.mrb[4].mxu0 %v668_v37  ;;  %v648_v15 = vmul.f32 %v3506_v39, %v624_v34  ;;  %v655_v56 = vmul.f32 %v3878_v28, %v647_v16 }
  0xeb   : > { %1117 = vmatprep.mubr.bf16.mxu0 %v3567_v60  ;;  %3164 = vmatprep.mubr.msk.bf16.mxu1 %vm3569_vm0, %v3568_v52 }
  0xec   : > { %v656_v2 = vmul.f32 %v3878_v28, %v648_v15  ;;  %v663_v41 = vadd.f32 %v3889_v43, %v655_v56 }
  0xee   : > { %v664_v36 = vadd.f32 %v3889_v43, %v656_v2 }
  0xef   : > { %v3508_v59 = vpop.eup %3507 }
  0xf0   : > { %v669_v12 = vpack.c.bf16 %v664_v36, %v663_v41  ;;  %v649_v42 = vmul.f32 %v3508_v59, %v625_v23 }
  0xf1   : > { %v3510_v35 = vpop.eup %3509 }
  0xf2   : > { %1118 = vmatmul.mubr.bf16.gmra.mrb[8].mxu0 %v669_v12  ;;  %v650_v44 = vmul.f32 %v3510_v35, %v626_v30  ;;  %v657_v49 = vmul.f32 %v3878_v28, %v649_v42 }
  0xf3   : > { %1127 = vmatprep.mubr.bf16.mxu0 %v3567_v60 }
  0xf4   : > { %v658_v6 = vmul.f32 %v3878_v28, %v650_v44  ;;  %v665_v50 = vadd.f32 %v3889_v43, %v657_v49 }
  0xf6   : > { %v666_v17 = vadd.f32 %v3889_v43, %v658_v6 }
  0xf8   : > { %v670_v14 = vpack.c.bf16 %v666_v17, %v665_v50 }
  0xfa   : > { %1128 = vmatmul.mubr.bf16.gmra.mrb[12].mxu0 %v670_v14 }
  0xfb   : > { %3158 = vmatprep.mubr.msk.bf16.mxu0 %vm3569_vm0, %v3568_v52 }
 0x195   : > { %v865_v60 = vpop.f32.mrb[0].mxu1 }
 0x196   : > { %v867_v8 = vpop.f32.mrb[1].mxu1  ;;  %v4029_v61 = vpack.c.bf16 %v865_v60, %v865_v60 }
 0x197   : > { %v1146_v28 = vpack.c.bf16 %v867_v8, %v867_v8  ;;  %v869_v53 = vpop.f32.mrb[2].mxu1 }
 0x198   : > { %v871_v54 = vpop.f32.mrb[3].mxu1  ;;  %v4031_v1 = vpack.c.bf16 %v869_v53, %v869_v53 }
 0x199   : > { %v1147_v43 = vpack.c.bf16 %v871_v54, %v871_v54  ;;  %3157 = vmatpush3.bf16.xpose.msra.mxu0 %v1146_v28 }
 0x19a   : > { %3192 = vmatprep.subr.bf16.mxu0 %v3568_v52 }
 0x19b   : > { %3163 = vmatpush3.bf16.xpose.msra.mxu1 %v1147_v43 }
 0x19c   : > { %3168 = vmatprep.subr.bf16.mxu1 %v3568_v52 }
 0x19d   : > { %v875_v58 = vpop.f32.mrb[4].mxu1 }
 0x19e   : > { %v877_v62 = vpop.f32.mrb[5].mxu1  ;;  %v4040_v25 = vpack.c.bf16 %v875_v58, %v875_v58 }
 0x19f   : > { %v879_v63 = vpop.f32.mrb[6].mxu1  ;;  %v1148_v20 = vpack.c.bf16 %v877_v62, %v877_v62 }
 0x1a0   : > { %v881_v38 = vpop.f32.mrb[7].mxu1  ;;  %3159 = vmatmul.mubr.bf16.vlgmr.msra.gmra.mrb[16].mxu0 %v4029_v61  ;;  %v4048_v51 = vpack.c.bf16 %v879_v63, %v879_v63 }
 0x1a1   : > { %3194 = vmatprep.mubr.msk.bf16.mxu0 %vm3569_vm0, %v3568_v52  ;;  %v1149_v7 = vpack.c.bf16 %v881_v38, %v881_v38 }
 0x1a2   : > { %3165 = vmatmul.mubr.bf16.vlgmr.msra.gmra.mrb[24].mxu1 %v4031_v1 }
 0x1a3   : > { %3169 = vmatpush3.bf16.xpose.msra.mxu1 %v1148_v20  ;;  %3170 = vmatprep.mubr.msk.bf16.mxu1 %vm3569_vm0, %v3568_v52 }
 0x1a4   : > { %3174 = vmatprep.subr.bf16.mxu1 %v3568_v52 }
 0x1a5   : > { %v885_v9 = vpop.f32.mrb[8].mxu1 }
 0x1a6   : > { %v887_v45 = vpop.f32.mrb[9].mxu1  ;;  %v4063_v48 = vpack.c.bf16 %v885_v9, %v885_v9 }
 0x1a7   : > { %v889_v5 = vpop.f32.mrb[10].mxu1  ;;  %v1150_v19 = vpack.c.bf16 %v887_v45, %v887_v45 }
 0x1a8   : > { %v891_v33 = vpop.f32.mrb[11].mxu1  ;;  %v4087_v35 = vpack.c.bf16 %v889_v5, %v889_v5 }
 0x1a9   : > { %v1151_v32 = vpack.c.bf16 %v891_v33, %v891_v33 }
 0x1aa   : > { %3171 = vmatmul.mubr.bf16.vlgmr.msra.gmra.mrb[28].mxu1 %v4040_v25 }
 0x1ab   : > { %3175 = vmatpush3.bf16.xpose.msra.mxu1 %v1149_v7  ;;  %3176 = vmatprep.mubr.msk.bf16.mxu1 %vm3569_vm0, %v3568_v52 }
 0x1ac   : > { %3180 = vmatprep.subr.bf16.mxu1 %v3568_v52 }
 0x1ad   : > { %v895_v11 = vpop.f32.mrb[12].mxu1 }
 0x1ae   : > { %v897_v13 = vpop.f32.mrb[13].mxu1  ;;  %v4057_v21 = vpack.c.bf16 %v895_v11, %v895_v11 }
 0x1af   : > { %v1152_v18 = vpack.c.bf16 %v897_v13, %v897_v13  ;;  %v4046_v10 = vpop.f32.mrb[14].mxu1 }
 0x1b0   : > { %v4050_v0 = vpop.f32.mrb[15].mxu1  ;;  %v1145_v20 = vpack.c.bf16 %v4046_v10, %v4046_v10 }
 0x1b1   : > { %3193 = vmatpush3.bf16.xpose.msra.mxu0 %v1152_v18  ;;  %v1153_v44 = vpack.c.bf16 %v4050_v0, %v4050_v0 }
 0x1b2   : > { %3177 = vmatmul.mubr.bf16.vlgmr.msra.gmra.mrb[32].mxu1 %v4048_v51  ;;  %3204 = vmatprep.subr.bf16.mxu0 %v3568_v52 }
 0x1b3   : > { %3181 = vmatpush3.bf16.xpose.msra.mxu1 %v1150_v19  ;;  %3182 = vmatprep.mubr.msk.bf16.mxu1 %vm3569_vm0, %v3568_v52 }
 0x1b4   : > { %3186 = vmatprep.subr.bf16.mxu1 %v3568_v52 }
 0x1b5   : > { %v3150_v46 = vpop.f32.mrb[16].mxu1  ;;  %v1099_v47 = vpop.f32.mrb[0].mxu0 }
 0x1b6   : > { %v1973_v22 = vpack.c.bf16 %v3150_v46, %v3150_v46  ;;  %v938_v24 = vpop.f32.mrb[17].mxu1  ;;  %v1474_v26 = vpack.c.bf16 %v1099_v47, %v1099_v47  ;;  %v4059_v27 = vpop.f32.mrb[1].mxu0 }
 0x1b7   : > { %v1971_v4 = vpack.c.bf16 %v938_v24, %v938_v24  ;;  %v3151_v3 = vpop.f32.mrb[18].mxu1  ;;  %v4061_v57 = vpop.f32.mrb[2].mxu0  ;;  %v1987_v24 = vpack.c.bf16 %v4059_v27, %v4059_v27 }
 0x1b8   : > { %v4066_v55 = vsel %vm1998_vm1, %v1973_v22, 0  ;;  %v1974_v29 = vpack.c.bf16 %v3151_v3, %v3151_v3  ;;  %v941_v31 = vpop.f32.mrb[19].mxu1  ;;  %3195 = vmatmul.mubr.bf16.vlgmr.msra.gmra.mrb[20].mxu0 %v4057_v21  ;;  %v4069_v40 = vpop.f32.mrb[3].mxu0  ;;  %v1475_v45 = vpack.c.bf16 %v4061_v57, %v4061_v57 }
 0x1b9   : > { %v4072_v34 = vsel %vm1998_vm1, %v1971_v4, 0  ;;  %v1972_v37 = vpack.c.bf16 %v941_v31, %v941_v31  ;;  %3205 = vmatpush3.bf16.xpose.msra.mxu0 %v1474_v26  ;;  %3206 = vmatprep.mubr.msk.bf16.mxu0 %vm3569_vm0, %v3568_v52  ;;  %v2000_v26 = vsel %vm1998_vm1, %v1987_v24, 0 }
 0x1ba   : > { %v4077_v16 = vsel %vm1998_vm1, %v1974_v29, 0  ;;  %3183 = vmatmul.mubr.bf16.vlgmr.msra.gmra.mrb[36].mxu1 %v4063_v48  ;;  %3216 = vmatprep.subr.bf16.mxu0 %v3568_v52 }
 0x1bb   : > { %v4082_v39 = vsel %vm1998_vm1, %v1972_v37, 0  ;;  %3187 = vmatpush3.bf16.xpose.msra.mxu1 %v1151_v32  ;;  %3188 = vmatprep.mubr.msk.bf16.mxu1 %vm3569_vm0, %v3568_v52 }
 0x1bc   : > { %3198 = vmatprep.subr.bf16.mxu1 %v3568_v52 }
 0x1bd   : > { %v3154_v15 = vpop.f32.mrb[20].mxu1  ;;  %v1109_v56 = vpop.f32.mrb[4].mxu0 }
 0x1be   : > { %v1977_v23 = vpack.c.bf16 %v3154_v15, %v3154_v15  ;;  %v954_v2 = vpop.f32.mrb[21].mxu1  ;;  %v1476_v41 = vpack.c.bf16 %v1109_v56, %v1109_v56  ;;  %v1111_v36 = vpop.f32.mrb[5].mxu0 }
 0x1bf   : > { %v1975_v59 = vpack.c.bf16 %v954_v2, %v954_v2  ;;  %v3155_v30 = vpop.f32.mrb[22].mxu1  ;;  %v1989_v12 = vpack.c.bf16 %v1111_v36, %v1111_v36  ;;  %v1113_v42 = vpop.f32.mrb[6].mxu0 }
 0x1c0   : > { %v4092_v49 = vsel %vm1998_vm1, %v1977_v23, 0  ;;  %v1978_v6 = vpack.c.bf16 %v3155_v30, %v3155_v30  ;;  %v957_v50 = vpop.f32.mrb[23].mxu1  ;;  %3207 = vmatmul.mubr.bf16.vlgmr.msra.gmra.mrb[24].mxu0 %v4029_v61  ;;  %v1115_v17 = vpop.f32.mrb[7].mxu0  ;;  %v1477_v19 = vpack.c.bf16 %v1113_v42, %v1113_v42 }
 0x1c1   : > { %v4096_v14 = vsel %vm1998_vm1, %v1975_v59, 0  ;;  %v1976_v60 = vpack.c.bf16 %v957_v50, %v957_v50  ;;  %v4099_v8 = vsel %vm1998_vm1, %v1989_v12, 0  ;;  %3217 = vmatpush3.bf16.xpose.msra.mxu0 %v1476_v41  ;;  %v1990_v28 = vpack.c.bf16 %v1115_v17, %v1115_v17  ;;  %3218 = vmatprep.mubr.msk.bf16.mxu0 %vm3569_vm0, %v3568_v52 }
 0x1c2   : > { %v4104_v53 = vsel %vm1998_vm1, %v1978_v6, 0  ;;  %3189 = vmatmul.mubr.bf16.vlgmr.msra.gmra.mrb[40].mxu1 %v4087_v35  ;;  %3228 = vmatprep.subr.bf16.mxu0 %v3568_v52 }
 0x1c3   : > { %v4109_v54 = vsel %vm1998_vm1, %v1976_v60, 0  ;;  %v4112_v43 = vsel %vm1998_vm1, %v1990_v28, 0  ;;  %3199 = vmatpush3.bf16.xpose.msra.mxu1 %v1153_v44  ;;  %3200 = vmatprep.mubr.msk.bf16.mxu1 %vm3569_vm0, %v3568_v52 }
 0x1c4   : > { %3210 = vmatprep.subr.bf16.mxu1 %v3568_v52 }
 0x1c5   : > { %v1119_v58 = vpop.f32.mrb[8].mxu0 }
 0x1c6   : > { %v1478_v61 = vpack.c.bf16 %v1119_v58, %v1119_v58  ;;  %v1121_v62 = vpop.f32.mrb[9].mxu0 }
 0x1c7   : > { %v1991_v63 = vpack.c.bf16 %v1121_v62, %v1121_v62  ;;  %v1123_v38 = vpop.f32.mrb[10].mxu0 }
 0x1c8   : > { %3219 = vmatmul.mubr.bf16.vlgmr.msra.gmra.mrb[28].mxu0 %v4040_v25  ;;  %v1125_v9 = vpop.f32.mrb[11].mxu0  ;;  %v1479_v4 = vpack.c.bf16 %v1123_v38, %v1123_v38 }
 0x1c9   : > { %v4123_v5 = vsel %vm1998_vm1, %v1991_v63, 0  ;;  %3229 = vmatpush3.bf16.xpose.msra.mxu0 %v1478_v61  ;;  %v1992_v33 = vpack.c.bf16 %v1125_v9, %v1125_v9  ;;  %3230 = vmatprep.mubr.msk.bf16.mxu0 %vm3569_vm0, %v3568_v52 }
 0x1ca   : > { %3201 = vmatmul.mubr.bf16.vlgmr.msra.gmra.mrb[44].mxu1 %v1145_v20  ;;  %3240 = vmatprep.subr.bf16.mxu0 %v3568_v52 }
 0x1cb   : > { %v4129_v7 = vsel %vm1998_vm1, %v1992_v33, 0  ;;  %3211 = vmatpush3.bf16.xpose.msra.mxu1 %v1475_v45  ;;  %3212 = vmatprep.mubr.msk.bf16.mxu1 %vm3569_vm0, %v3568_v52 }
 0x1cc   : > { %3222 = vmatprep.subr.bf16.mxu1 %v3568_v52 }
 0x1cd   : > { %v1129_v25 = vpop.f32.mrb[12].mxu0 }
 0x1ce   : > { %v1480_v11 = vpack.c.bf16 %v1129_v25, %v1129_v25  ;;  %v1131_v13 = vpop.f32.mrb[13].mxu0 }
 0x1cf   : > { %v1993_v18 = vpack.c.bf16 %v1131_v13, %v1131_v13  ;;  %v1133_v10 = vpop.f32.mrb[14].mxu0 }
 0x1d0   : > { %3231 = vmatmul.mubr.bf16.vlgmr.msra.gmra.mrb[32].mxu0 %v4063_v48  ;;  %v1135_v0 = vpop.f32.mrb[15].mxu0 }
 0x1d1   : > { %v4136_v46 = vsel %vm1998_vm1, %v1993_v18, 0  ;;  %3241 = vmatpush3.bf16.xpose.msra.mxu0 %v1480_v11  ;;  %v1994_v47 = vpack.c.bf16 %v1135_v0, %v1135_v0  ;;  %3242 = vmatprep.mubr.msk.bf16.mxu0 %vm3569_vm0, %v3568_v52 }
 0x1d2   : > { %3213 = vmatmul.mubr.bf16.vlgmr.msra.gmra.mrb[48].mxu1 %v4031_v1  ;;  %3252 = vmatprep.subr.bf16.mxu0 %v3568_v52  ;;  %v1481_v1 = vpack.c.bf16 %v1133_v10, %v1133_v10 }
 0x1d3   : > { %v4143_v22 = vsel %vm1998_vm1, %v1994_v47, 0  ;;  %3223 = vmatpush3.bf16.xpose.msra.mxu1 %v1477_v19  ;;  %3224 = vmatprep.mubr.msk.bf16.mxu1 %vm3569_vm0, %v3568_v52 }
 0x1d4   : > { %3234 = vmatprep.subr.bf16.mxu1 %v3568_v52 }
 0x1d8   : > { %3243 = vmatmul.mubr.bf16.vlgmr.msra.gmra.mrb[36].mxu0 %v4057_v21 }
 0x1d9   : > { %3253 = vmatpush3.bf16.msra.mxu0 %v2000_v26  ;;  %3254 = vmatprep.mubr.msk.bf16.mxu0 %vm3569_vm0, %v3568_v52 }
 0x1da   : > { %3225 = vmatmul.mubr.bf16.vlgmr.msra.gmra.mrb[52].mxu1 %v4048_v51  ;;  %3264 = vmatprep.subr.bf16.mxu0 %v3568_v52  ;;  %v1988_v51 = vpack.c.bf16 %v4069_v40, %v4069_v40 }
 0x1db   : > { %3235 = vmatpush3.bf16.xpose.msra.mxu1 %v1479_v4  ;;  %3236 = vmatprep.mubr.msk.bf16.mxu1 %vm3569_vm0, %v3568_v52 }
 0x1dc   : > { %3246 = vmatprep.subr.bf16.mxu1 %v3568_v52  ;;  %v2046_v21 = vsel %vm1998_vm1, %v1988_v51, 0 }
 0x1e2   : > { %3237 = vmatmul.mubr.bf16.vlgmr.msra.gmra.mrb[56].mxu1 %v4087_v35 }
 0x1e3   : > { %3247 = vmatpush3.bf16.xpose.msra.mxu1 %v1481_v1  ;;  %3248 = vmatprep.mubr.msk.bf16.mxu1 %vm3569_vm0, %v3568_v52 }
 0x1e4   : > { %3258 = vmatprep.subr.bf16.mxu1 %v3568_v52 }
 0x1ea   : > { %3249 = vmatmul.mubr.bf16.vlgmr.msra.gmra.mrb[60].mxu1 %v1145_v20 }
 0x1eb   : > { %3259 = vmatpush3.bf16.msra.mxu1 %v2046_v21  ;;  %3260 = vmatprep.mubr.msk.bf16.mxu1 %vm3569_vm0, %v3568_v52 }
 0x1ec   : > { %3270 = vmatprep.subr.bf16.mxu1 %v3568_v52 }
 0x273   : > { %v4169_v27 = vpop.f32.mrb[16].mxu0 }
 0x274   : > { %v3160_v3 = vpop.f32.mrb[17].mxu0  ;;  %v1803_v57 = vsel %vm1802_vm2, %v4169_v27, -inf }
 0x275   : > { %v4173_v48 = vpop.f32.mrb[24].mxu1  ;;  %1804 = vmax.xlane.f32.xlu0 %v1803_v57  ;;  %v1191_v29 = vpop.f32.mrb[18].mxu0 }
 0x276   : > { %v3161_v31 = vpop.f32.mrb[19].mxu0  ;;  %v3166_v40 = vpop.f32.mrb[25].mxu1  ;;  %v1806_v32 = vsel %vm1802_vm2, %v4173_v48, -inf }
 0x277   : > { %1807 = vmax.xlane.f32.xlu1 %v1806_v32  ;;  %v1231_v37 = vpop.f32.mrb[26].mxu1 }
 0x278   : > { %v3167_v15 = vpop.f32.mrb[27].mxu1 }
 0x27d   : > { %v4177_v56 = vpop.f32.mrb[28].mxu1 }
 0x27e   : > { %v3172_v23 = vpop.f32.mrb[29].mxu1  ;;  %v1809_v25 = vsel %vm1802_vm2, %v4177_v56, -inf }
 0x27f   : > { %v1271_v2 = vpop.f32.mrb[30].mxu1 }
 0x280   : > { %v3173_v41 = vpop.f32.mrb[31].mxu1 }
 0x285   : > { %v4179_v36 = vpop.f32.mrb[32].mxu1 }
 0x286   : > { %v3178_v59 = vpop.f32.mrb[33].mxu1  ;;  %v1812_v23 = vsel %vm1802_vm2, %v4179_v36, -inf }
 0x287   : > { %v1311_v30 = vpop.f32.mrb[34].mxu1 }
 0x288   : > { %v3179_v12 = vpop.f32.mrb[35].mxu1 }
 0x28b   : > { %v4181_v42 = vpop.f32.mrb[20].mxu0 }
 0x28c   : > { %v3196_v35 = vpop.f32.mrb[21].mxu0  ;;  %v1821_v15 = vsel %vm1802_vm2, %v4181_v42, -inf }
 0x28d   : > { %v4183_v44 = vpop.f32.mrb[36].mxu1  ;;  %v1431_v6 = vpop.f32.mrb[22].mxu0 }
 0x28e   : > { %v3184_v50 = vpop.f32.mrb[37].mxu1  ;;  %v3197_v17 = vpop.f32.mrb[23].mxu0  ;;  %v1815_v4 = vsel %vm1802_vm2, %v4183_v44, -inf }
 0x28f   : > { %v1351_v60 = vpop.f32.mrb[38].mxu1 }
 0x290   : > { %v3185_v28 = vpop.f32.mrb[39].mxu1 }
 0x293   : > { %v4185_v58 = vpop.f32.mrb[24].mxu0 }
 0x294   : > { %v3208_v61 = vpop.f32.mrb[25].mxu0  ;;  %v1827_v62 = vsel %vm1802_vm2, %v4185_v58, -inf }
 0x295   : > { %v4189_v63 = vpop.f32.mrb[40].mxu1  ;;  %1828 = vmax.xlane.f32.xlu0 %v1827_v62  ;;  %v1519_v38 = vpop.f32.mrb[26].mxu0 }
 0x296   : > { %v3190_v20 = vpop.f32.mrb[41].mxu1  ;;  %v3209_v9 = vpop.f32.mrb[27].mxu0  ;;  %v1818_v28 = vsel %vm1802_vm2, %v4189_v63, -inf }
 0x297   : > { %v1391_v45 = vpop.f32.mrb[42].mxu1 }
 0x298   : > { %v3191_v33 = vpop.f32.mrb[43].mxu1 }
 0x299   : > { %1810 = vmax.xlane.f32.xlu0 %v1809_v25 }
 0x29b   : > { %v4193_v11 = vpop.f32.mrb[28].mxu0 }
 0x29c   : > { %v3220_v13 = vpop.f32.mrb[29].mxu0  ;;  %v1833_v18 = vsel %vm1802_vm2, %v4193_v11, -inf }
 0x29d   : > { %v4197_v10 = vpop.f32.mrb[44].mxu1  ;;  %1834 = vmax.xlane.f32.xlu0 %v1833_v18  ;;  %v1599_v0 = vpop.f32.mrb[30].mxu0 }
 0x29e   : > { %v3202_v19 = vpop.f32.mrb[45].mxu1  ;;  %v3221_v47 = vpop.f32.mrb[31].mxu0  ;;  %v1824_v45 = vsel %vm1802_vm2, %v4197_v10, -inf }
 0x29f   : > { %v1471_v24 = vpop.f32.mrb[46].mxu1 }
 0x2a0   : > { %v3203_v26 = vpop.f32.mrb[47].mxu1 }
 0x2a1   : > { %1816 = vmax.xlane.f32.xlu0 %v1815_v4 }
 0x2a3   : > { %v4201_v1 = vpop.f32.mrb[32].mxu0 }
 0x2a4   : > { %v3232_v51 = vpop.f32.mrb[33].mxu0  ;;  %v1839_v21 = vsel %vm1802_vm2, %v4201_v1, -inf }
 0x2a5   : > { %v4205_v3 = vpop.f32.mrb[48].mxu1  ;;  %1840 = vmax.xlane.f32.xlu0 %v1839_v21  ;;  %v1679_v57 = vpop.f32.mrb[34].mxu0 }
 0x2a6   : > { %v3214_v29 = vpop.f32.mrb[49].mxu1  ;;  %v3233_v31 = vpop.f32.mrb[35].mxu0  ;;  %v1830_v40 = vsel %vm1802_vm2, %v4205_v3, -inf }
 0x2a7   : > { %1831 = vmax.xlane.f32.xlu1 %v1830_v40  ;;  %v1559_v32 = vpop.f32.mrb[50].mxu1 }
 0x2a8   : > { %v3215_v37 = vpop.f32.mrb[51].mxu1 }
 0x2a9   : > { %1822 = vmax.xlane.f32.xlu0 %v1821_v15 }
 0x2ab   : > { %1813 = vmax.xlane.f32.xlu1 %v1812_v23  ;;  %v4213_v2 = vpop.f32.mrb[36].mxu0 }
 0x2ac   : > { %v3244_v41 = vpop.f32.mrb[37].mxu0  ;;  %v1845_v59 = vsel %vm1802_vm2, %v4213_v2, -inf }
 0x2ad   : > { %v4217_v30 = vpop.f32.mrb[52].mxu1  ;;  %1846 = vmax.xlane.f32.xlu0 %v1845_v59  ;;  %v1759_v12 = vpop.f32.mrb[38].mxu0 }
 0x2ae   : > { %v3226_v35 = vpop.f32.mrb[53].mxu1  ;;  %v3245_v6 = vpop.f32.mrb[39].mxu0  ;;  %v1836_v50 = vsel %vm1802_vm2, %v4217_v30, -inf }
 0x2af   : > { %1837 = vmax.xlane.f32.xlu1 %v1836_v50  ;;  %v1639_v17 = vpop.f32.mrb[54].mxu1 }
 0x2b0   : > { %v3227_v60 = vpop.f32.mrb[55].mxu1 }
 0x2b3   : > { %1819 = vmax.xlane.f32.xlu1 %v1818_v28 }
 0x2b5   : > { %v4223_v61 = vpop.f32.mrb[56].mxu1 }
 0x2b6   : > { %v3238_v62 = vpop.f32.mrb[57].mxu1  ;;  %v1842_v38 = vsel %vm1802_vm2, %v4223_v61, -inf }
 0x2b7   : > { %1843 = vmax.xlane.f32.xlu1 %v1842_v38  ;;  %v1719_v20 = vpop.f32.mrb[58].mxu1 }
 0x2b8   : > { %v3239_v9 = vpop.f32.mrb[59].mxu1 }
 0x2bb   : > { %1825 = vmax.xlane.f32.xlu1 %v1824_v45 }
 0x2bd   : > { %v4229_v33 = vpop.f32.mrb[60].mxu1 }
 0x2be   : > { %v3250_v25 = vpop.f32.mrb[61].mxu1  ;;  %v1848_v13 = vsel %vm1802_vm2, %v4229_v33, -inf }
 0x2bf   : > { %1849 = vmax.xlane.f32.xlu1 %v1848_v13  ;;  %v1799_v18 = vpop.f32.mrb[62].mxu1 }
 0x2c0   : > { %v3251_v0 = vpop.f32.mrb[63].mxu1 }
 0x302   : > { %v1805_v19 = vpop.xlane.xlu0 %1804 }
 0x304   : > { %v1808_v41 = vpop.xlane.xlu1 %1807 }
 0x322   : > { %v1829_v47 = vpop.xlane.xlu0 %1828 }
 0x323   : > { %v1851_v24 = vmax.f32 %v1805_v19, %v1829_v47 }
 0x325   : > { %v1859_v26 = vsub.f32 %v4169_v27, %v1851_v24  ;;  %v1883_v4 = vsub.f32 %v4185_v58, %v1851_v24 }
 0x326   : > { %v1811_v51 = vpop.xlane.xlu0 %1810 }
 0x327   : > { %v1867_v21 = vmul.f32 1.442695, %v1859_v26  ;;  %v1891_v57 = vmul.f32 1.442695, %v1883_v4 }
 0x329   : > { %3511 = vpow2.f32 %v1867_v21 }
 0x32a   : > { %3513 = vpow2.f32 %v1891_v57  ;;  %v1835_v29 = vpop.xlane.xlu0 %1834 }
 0x32b   : > { %v1853_v31 = vmax.f32 %v1811_v51, %v1835_v29 }
 0x32d   : > { %v1861_v40 = vsub.f32 %v4177_v56, %v1853_v31  ;;  %v1885_v32 = vsub.f32 %v4193_v11, %v1853_v31 }
 0x32e   : > { %v1817_v37 = vpop.xlane.xlu0 %1816 }
 0x32f   : > { %v1871_v15 = vmul.f32 1.442695, %v1861_v40  ;;  %v1895_v23 = vmul.f32 1.442695, %v1885_v32 }
 0x331   : > { %3515 = vpow2.f32 %v1871_v15 }
 0x332   : > { %3517 = vpow2.f32 %v1895_v23  ;;  %v1841_v27 = vpop.xlane.xlu0 %1840 }
 0x333   : > { %v4237_v59 = vpop.eup %3511  ;;  %v1855_v58 = vmax.f32 %v1817_v37, %v1841_v27 }
 0x334   : > { %v3514_v12 = vpop.eup %3513  ;;  %v1832_v35 = vpop.xlane.xlu1 %1831  ;;  %v1907_v6 = vsel %vm1802_vm2, %v4237_v59, 0.0 }
 0x335   : > { %v1863_v50 = vsub.f32 %v4183_v44, %v1855_v58  ;;  %v1887_v56 = vsub.f32 %v4201_v1, %v1855_v58  ;;  %v1852_v11 = vmax.f32 %v1808_v41, %v1832_v35  ;;  %1908 = vadd.xlane.f32.xlu0 %v1907_v6  ;;  %v1979_v17 = vpack.c.bf16 %v3514_v12, %v3514_v12 }
 0x336   : > { %v1823_v60 = vpop.xlane.xlu0 %1822  ;;  %v1931_v45 = vsel %vm1802_vm2, %v3514_v12, 0.0 }
 0x337   : > { %v1875_v28 = vmul.f32 1.442695, %v1863_v50  ;;  %v1899_v62 = vmul.f32 1.442695, %v1887_v56  ;;  %v1860_v38 = vsub.f32 %v4173_v48, %v1852_v11  ;;  %v1884_v20 = vsub.f32 %v4205_v3, %v1852_v11  ;;  %3255 = vmatmul.mubr.msk.bf16.vlgmr.msra.gmra.mrb[40].mxu0 %vm1802_vm2, %v1979_v17 }
 0x338   : > { %3265 = vmatpush3.bf16.msra.mxu0 %v4099_v8  ;;  %v1814_v9 = vpop.xlane.xlu1 %1813  ;;  %3266 = vmatprep.mubr.msk.bf16.mxu0 %vm3569_vm0, %v3568_v52 }
 0x339   : > { %3519 = vpow2.f32 %v1875_v28  ;;  %v1869_v44 = vmul.f32 1.442695, %v1860_v38  ;;  %v1893_v1 = vmul.f32 1.442695, %v1884_v20  ;;  %1932 = vadd.xlane.f32.xlu0 %v1931_v45  ;;  %3276 = vmatprep.subr.bf16.mxu0 %v3568_v52 }
 0x33a   : > { %3521 = vpow2.f32 %v1899_v62  ;;  %v1847_v48 = vpop.xlane.xlu0 %1846 }
 0x33b   : > { %v4251_v25 = vpop.eup %3515  ;;  %3523 = vpow2.f32 %v1869_v44  ;;  %v1857_v3 = vmax.f32 %v1823_v60, %v1847_v48 }
 0x33c   : > { %v3518_v13 = vpop.eup %3517  ;;  %3525 = vpow2.f32 %v1893_v1  ;;  %v1838_v8 = vpop.xlane.xlu1 %1837  ;;  %v1913_v18 = vsel %vm1802_vm2, %v4251_v25, 0.0 }
 0x33d   : > { %v1865_v0 = vsub.f32 %v4181_v42, %v1857_v3  ;;  %v1889_v19 = vsub.f32 %v4213_v2, %v1857_v3  ;;  %v1854_v47 = vmax.f32 %v1814_v9, %v1838_v8  ;;  %1914 = vadd.xlane.f32.xlu0 %v1913_v18  ;;  %v1981_v24 = vpack.c.bf16 %v3518_v13, %v3518_v13 }
 0x33e   : > { %v1937_v29 = vsel %vm1802_vm2, %v3518_v13, 0.0 }
 0x33f   : > { %v1879_v26 = vmul.f32 1.442695, %v1865_v0  ;;  %v1903_v4 = vmul.f32 1.442695, %v1889_v19  ;;  %v1862_v51 = vsub.f32 %v4179_v36, %v1854_v47  ;;  %v1886_v21 = vsub.f32 %v4217_v30, %v1854_v47  ;;  %3267 = vmatmul.mubr.msk.bf16.vlgmr.msra.gmra.mrb[44].mxu0 %vm1802_vm2, %v1981_v24  ;;  %v3472_v47 = vld [vmem:[%s4406_s7 + $0x8] sm:$0xff]   ;;  %v3473_v24 = vld [vmem:[%s4406_s7 + $0x10] sm:$0xff]  }
 0x340   : > { %3277 = vmatpush3.bf16.msra.mxu0 %v4123_v5  ;;  %v1820_v57 = vpop.xlane.xlu1 %1819  ;;  %3278 = vmatprep.mubr.msk.bf16.mxu0 %vm3569_vm0, %v3568_v52 }
 0x341   : > { %3527 = vpow2.f32 %v1879_v26  ;;  %v1873_v42 = vmul.f32 1.442695, %v1862_v51  ;;  %v1897_v2 = vmul.f32 1.442695, %v1886_v21  ;;  %1938 = vadd.xlane.f32.xlu0 %v1937_v29  ;;  %3288 = vmatprep.subr.bf16.mxu0 %v3568_v52  ;;  %v3476_v26 = vld [vmem:[%s4406_s7 + $0x28] sm:$0xff]   ;;  %v3478_v51 = vld [vmem:[%s4406_s7 + $0x38] sm:$0xff]  }
 0x342   : > { %3529 = vpow2.f32 %v1903_v4  ;;  %v3477_v4 = vld [vmem:[%s4406_s7 + $0x30] sm:$0xff]  }
 0x343   : > { %v4265_v36 = vpop.eup %3519  ;;  %3531 = vpow2.f32 %v1873_v42 }
 0x344   : > { %v3522_v30 = vpop.eup %3521  ;;  %3533 = vpow2.f32 %v1897_v2  ;;  %v1844_v31 = vpop.xlane.xlu1 %1843  ;;  %v1919_v5 = vsel %vm1802_vm2, %v4265_v36, 0.0 }
 0x345   : > { %v4269_v40 = vpop.eup %3523  ;;  %v1856_v32 = vmax.f32 %v1820_v57, %v1844_v31  ;;  %1920 = vadd.xlane.f32.xlu0 %v1919_v5  ;;  %v1983_v37 = vpack.c.bf16 %v3522_v30, %v3522_v30  ;;  %v1943_v35 = vsel %vm1802_vm2, %v3522_v30, 0.0 }
 0x346   : > { %v3526_v15 = vpop.eup %3525  ;;  %v1910_v23 = vsel %vm1802_vm2, %v4269_v40, 0.0 }
 0x347   : > { %v1864_v41 = vsub.f32 %v4189_v63, %v1856_v32  ;;  %v1888_v27 = vsub.f32 %v4223_v61, %v1856_v32  ;;  %3279 = vmatmul.mubr.msk.bf16.vlgmr.msra.gmra.mrb[48].mxu0 %vm1802_vm2, %v1983_v37  ;;  %1911 = vadd.xlane.f32.xlu1 %v1910_v23  ;;  %v1980_v58 = vpack.c.bf16 %v3526_v15, %v3526_v15  ;;  %v1934_v63 = vsel %vm1802_vm2, %v3526_v15, 0.0 }
 0x348   : > { %3289 = vmatpush3.bf16.msra.mxu0 %v4136_v46  ;;  %v1826_v12 = vpop.xlane.xlu1 %1825  ;;  %3290 = vmatprep.mubr.msk.bf16.mxu0 %vm3569_vm0, %v3568_v52 }
 0x349   : > { %v1877_v6 = vmul.f32 1.442695, %v1864_v41  ;;  %v1901_v50 = vmul.f32 1.442695, %v1888_v27  ;;  %3261 = vmatmul.mubr.msk.bf16.vlgmr.msra.gmra.mrb[64].mxu1 %vm1802_vm2, %v1980_v58  ;;  %1944 = vadd.xlane.f32.xlu0 %v1943_v35 }
 0x34a   : > { %3271 = vmatpush3.bf16.msra.mxu1 %v4112_v43  ;;  %3300 = vmatprep.subr.bf16.mxu0 %v3568_v52 }
 0x34b   : > { %v4284_v61 = vpop.eup %3527  ;;  %3535 = vpow2.f32 %v1877_v6  ;;  %1935 = vadd.xlane.f32.xlu1 %v1934_v63  ;;  %3272 = vmatprep.mubr.msk.bf16.mxu1 %vm3569_vm0, %v3568_v52 }
 0x34c   : > { %v3530_v46 = vpop.eup %3529  ;;  %3537 = vpow2.f32 %v1901_v50  ;;  %v1850_v56 = vpop.xlane.xlu1 %1849  ;;  %v1925_v11 = vsel %vm1802_vm2, %v4284_v61, 0.0  ;;  %3282 = vmatprep.subr.bf16.mxu1 %v3568_v52 }
 0x34d   : > { %v4291_v43 = vpop.eup %3531  ;;  %v1858_v17 = vmax.f32 %v1826_v12, %v1850_v56  ;;  %1926 = vadd.xlane.f32.xlu0 %v1925_v11  ;;  %v1985_v60 = vpack.c.bf16 %v3530_v46, %v3530_v46  ;;  %v1949_v45 = vsel %vm1802_vm2, %v3530_v46, 0.0 }
 0x34e   : > { %v3534_v28 = vpop.eup %3533  ;;  %v1916_v62 = vsel %vm1802_vm2, %v4291_v43, 0.0 }
 0x34f   : > { %v1866_v38 = vsub.f32 %v4197_v10, %v1858_v17  ;;  %v1890_v20 = vsub.f32 %v4229_v33, %v1858_v17  ;;  %3291 = vmatmul.mubr.msk.bf16.vlgmr.msra.gmra.mrb[52].mxu0 %vm1802_vm2, %v1985_v60  ;;  %1917 = vadd.xlane.f32.xlu1 %v1916_v62  ;;  %v1982_v9 = vpack.c.bf16 %v3534_v28, %v3534_v28  ;;  %v1940_v10 = vsel %vm1802_vm2, %v3534_v28, 0.0 }
 0x350   : > { %3301 = vmatpush3.bf16.msra.mxu0 %v4072_v34  ;;  %3302 = vmatprep.mubr.msk.bf16.mxu0 %vm3569_vm0, %v3568_v52  ;;  %v1963_v33 = vpack.c.bf16 %v4237_v59, %v4237_v59 }
 0x351   : > { %v1881_v44 = vmul.f32 1.442695, %v1866_v38  ;;  %v1905_v1 = vmul.f32 1.442695, %v1890_v20  ;;  %3273 = vmatmul.mubr.msk.bf16.vlgmr.msra.gmra.mrb[68].mxu1 %vm1802_vm2, %v1982_v9  ;;  %1950 = vadd.xlane.f32.xlu0 %v1949_v45 }
 0x352   : > { %3283 = vmatpush3.bf16.msra.mxu1 %v4129_v7  ;;  %3312 = vmatprep.subr.bf16.mxu0 %v3568_v52 }
 0x353   : > { %3539 = vpow2.f32 %v1881_v44  ;;  %1941 = vadd.xlane.f32.xlu1 %v1940_v10  ;;  %3284 = vmatprep.mubr.msk.bf16.mxu1 %vm3569_vm0, %v3568_v52 }
 0x354   : > { %3541 = vpow2.f32 %v1905_v1  ;;  %3294 = vmatprep.subr.bf16.mxu1 %v3568_v52 }
 0x355   : > { %v3536_v34 = vpop.eup %3535 }
 0x356   : > { %v3538_v48 = vpop.eup %3537  ;;  %v1922_v3 = vsel %vm1802_vm2, %v3536_v34, 0.0  ;;  %v1968_v19 = vpack.c.bf16 %v3536_v34, %v3536_v34 }
 0x357   : > { %3303 = vmatmul.mubr.msk.bf16.vlgmr.msra.gmra.mrb[40].mxu0 %vm1802_vm2, %v1963_v33  ;;  %1923 = vadd.xlane.f32.xlu1 %v1922_v3  ;;  %v1984_v7 = vpack.c.bf16 %v3538_v48, %v3538_v48  ;;  %v1946_v59 = vsel %vm1802_vm2, %v3538_v48, 0.0 }
 0x358   : > { %3313 = vmatpush3.bf16.msra.mxu0 %v4066_v55  ;;  %3314 = vmatprep.mubr.msk.bf16.mxu0 %vm3569_vm0, %v3568_v52  ;;  %v1965_v55 = vpack.c.bf16 %v4251_v25, %v4251_v25  ;;  %v1964_v25 = vpack.c.bf16 %v4269_v40, %v4269_v40 }
 0x359   : > { %3285 = vmatmul.mubr.msk.bf16.vlgmr.msra.gmra.mrb[72].mxu1 %vm1802_vm2, %v1984_v7  ;;  %3324 = vmatprep.subr.bf16.mxu0 %v3568_v52 }
 0x35a   : > { %3295 = vmatpush3.bf16.msra.mxu1 %v4143_v22  ;;  %3296 = vmatprep.mubr.msk.bf16.mxu1 %vm3569_vm0, %v3568_v52 }
 0x35b   : > { %1947 = vadd.xlane.f32.xlu1 %v1946_v59  ;;  %3306 = vmatprep.subr.bf16.mxu1 %v3568_v52 }
 0x35d   : > { %v3540_v13 = vpop.eup %3539 }
 0x35e   : > { %v3542_v8 = vpop.eup %3541  ;;  %v1928_v18 = vsel %vm1802_vm2, %v3540_v13, 0.0 }
 0x35f   : > { %3315 = vmatmul.mubr.msk.bf16.vlgmr.msra.gmra.mrb[44].mxu0 %vm1802_vm2, %v1965_v55  ;;  %1929 = vadd.xlane.f32.xlu1 %v1928_v18  ;;  %v1986_v0 = vpack.c.bf16 %v3542_v8, %v3542_v8  ;;  %v1952_v22 = vsel %vm1802_vm2, %v3542_v8, 0.0 }
 0x360   : > { %3325 = vmatpush3.bf16.msra.mxu0 %v4096_v14  ;;  %3326 = vmatprep.mubr.msk.bf16.mxu0 %vm3569_vm0, %v3568_v52  ;;  %v1967_v14 = vpack.c.bf16 %v4265_v36, %v4265_v36 }
 0x361   : > { %3297 = vmatmul.mubr.msk.bf16.vlgmr.msra.gmra.mrb[76].mxu1 %vm1802_vm2, %v1986_v0  ;;  %3336 = vmatprep.subr.bf16.mxu0 %v3568_v52 }
 0x362   : > { %3307 = vmatpush3.bf16.msra.mxu1 %v4082_v39  ;;  %3308 = vmatprep.mubr.msk.bf16.mxu1 %vm3569_vm0, %v3568_v52  ;;  %v1969_v39 = vpack.c.bf16 %v4284_v61, %v4284_v61 }
 0x363   : > { %1953 = vadd.xlane.f32.xlu1 %v1952_v22  ;;  %3318 = vmatprep.subr.bf16.mxu1 %v3568_v52 }
 0x367   : > { %3327 = vmatmul.mubr.msk.bf16.vlgmr.msra.gmra.mrb[48].mxu0 %vm1802_vm2, %v1967_v14 }
 0x368   : > { %3337 = vmatpush3.bf16.msra.mxu0 %v4092_v49  ;;  %3338 = vmatprep.mubr.msk.bf16.mxu0 %vm3569_vm0, %v3568_v52  ;;  %v1966_v49 = vpack.c.bf16 %v4291_v43, %v4291_v43 }
 0x369   : > { %3309 = vmatmul.mubr.msk.bf16.vlgmr.msra.gmra.mrb[64].mxu1 %vm1802_vm2, %v1964_v25 }
 0x36a   : > { %3319 = vmatpush3.bf16.msra.mxu1 %v4077_v16  ;;  %3320 = vmatprep.mubr.msk.bf16.mxu1 %vm3569_vm0, %v3568_v52  ;;  %v3471_v16 = vld [vmem:[%s4406_s7] sm:$0xff]  }
 0x36b   : > { %3330 = vmatprep.subr.bf16.mxu1 %v3568_v52  ;;  %3348 = vmatprep.subr.bf16.mxu0 %v3471_v16 }
 0x36f   : > { %3339 = vmatmul.mubr.msk.bf16.vlgmr.msra.gmra.mrb[52].mxu0 %vm1802_vm2, %v1969_v39 }
 0x370   : > { %3349 = vmatpush3.bf16.msra.mxu0 %v3471_v16 }
 0x371   : > { %3321 = vmatmul.mubr.msk.bf16.vlgmr.msra.gmra.mrb[68].mxu1 %vm1802_vm2, %v1966_v49  ;;  %3350 = vmatprep.subr.bf16.mxu0 %v3472_v47 }
 0x372   : > { %3331 = vmatpush3.bf16.msra.mxu1 %v4109_v54  ;;  %3332 = vmatprep.mubr.msk.bf16.mxu1 %vm3569_vm0, %v3568_v52  ;;  %v1970_v54 = vpack.c.bf16 %v3540_v13, %v3540_v13 }
 0x373   : > { %3342 = vmatprep.subr.bf16.mxu1 %v3568_v52 }
 0x374   : > { %3351 = vmatpush3.bf16.msra.mxu0 %v3472_v47 }
 0x375   : > { %3352 = vmatprep.subr.bf16.mxu0 %v3473_v24 }
 0x378   : > { %3353 = vmatpush3.bf16.msra.mxu0 %v3473_v24 }
 0x379   : > { %3333 = vmatmul.mubr.msk.bf16.vlgmr.msra.gmra.mrb[72].mxu1 %vm1802_vm2, %v1968_v19 }
 0x37a   : > { %3343 = vmatpush3.bf16.msra.mxu1 %v4104_v53  ;;  %3344 = vmatprep.mubr.msk.bf16.mxu1 %vm3569_vm0, %v3568_v52  ;;  %v3474_v53 = vld [vmem:[%s4406_s7 + $0x18] sm:$0xff]   ;;  %v3475_v52 = vld [vmem:[%s4406_s7 + $0x20] sm:$0xff]  }
 0x37b   : > { %3354 = vmatprep.subr.bf16.mxu0 %v3474_v53 }
 0x37c   : > { %3355 = vmatpush3.bf16.msra.mxu0 %v3474_v53 }
 0x37d   : > { %3356 = vmatprep.subr.bf16.mxu0 %v3475_v52 }
 0x380   : > { %3357 = vmatpush3.bf16.msra.mxu0 %v3475_v52 }
 0x381   : > { %3345 = vmatmul.mubr.msk.bf16.vlgmr.msra.gmra.mrb[76].mxu1 %vm1802_vm2, %v1970_v54  ;;  %3358 = vmatprep.subr.bf16.mxu0 %v3476_v26 }
 0x384   : > { %3359 = vmatpush3.bf16.msra.mxu0 %v3476_v26 }
 0x385   : > { %3360 = vmatprep.subr.bf16.mxu0 %v3477_v4 }
 0x388   : > { %3361 = vmatpush3.bf16.msra.mxu0 %v3477_v4 }
 0x389   : > { %3362 = vmatprep.subr.bf16.mxu0 %v3478_v51 }
 0x38c   : > { %3363 = vmatpush3.bf16.msra.mxu0 %v3478_v51 }
 0x3c2   : > { %v1909_v21 = vpop.xlane.xlu0 %1908 }
 0x3c6   : > { %v1933_v29 = vpop.xlane.xlu0 %1932 }
 0x3c7   : > { %v1955_v37 = vadd.f32 %v1933_v29, %v1909_v21 }
 0x3c9   : > { %3543 = vrcp.f32 %v1955_v37 }
 0x3ca   : > { %v1915_v2 = vpop.xlane.xlu0 %1914 }
 0x3ce   : > { %v1939_v30 = vpop.xlane.xlu0 %1938 }
 0x3cf   : > { %v1957_v50 = vadd.f32 %v1939_v30, %v1915_v2 }
 0x3d2   : > { %v1921_v23 = vpop.xlane.xlu0 %1920 }
 0x3d3   : > { %v3544_v43 = vpop.eup %3543 }
 0x3d4   : > { %v1912_v57 = vpop.xlane.xlu1 %1911 }
 0x3d6   : > { %v1945_v35 = vpop.xlane.xlu0 %1944 }
 0x3d7   : > { %v1959_v20 = vadd.f32 %v1945_v35, %v1921_v23 }
 0x3d8   : > { %v1936_v42 = vpop.xlane.xlu1 %1935 }
 0x3d9   : > { %v1956_v41 = vadd.f32 %v1936_v42, %v1912_v57 }
 0x3da   : > { %v1927_v56 = vpop.xlane.xlu0 %1926 }
 0x3db   : > { %3545 = vrcp.f32 %v1956_v41 }
 0x3dc   : > { %v1918_v36 = vpop.xlane.xlu1 %1917  ;;  %3547 = vrcp.f32 %v1957_v50 }
 0x3de   : > { %v1951_v3 = vpop.xlane.xlu0 %1950 }
 0x3df   : > { %v1961_v22 = vadd.f32 %v1951_v3, %v1927_v56 }
 0x3e0   : > { %v1942_v31 = vpop.xlane.xlu1 %1941 }
 0x3e1   : > { %v1958_v46 = vadd.f32 %v1942_v31, %v1918_v36 }
 0x3e3   : > { %3549 = vrcp.f32 %v1958_v46 }
 0x3e4   : > { %v1924_v27 = vpop.xlane.xlu1 %1923  ;;  %3551 = vrcp.f32 %v1959_v20 }
 0x3e5   : > { %v3546_v28 = vpop.eup %3545 }
 0x3e6   : > { %v3548_v59 = vpop.eup %3547 }
 0x3e8   : > { %v1948_v63 = vpop.xlane.xlu1 %1947 }
 0x3e9   : > { %v1960_v10 = vadd.f32 %v1948_v63, %v1924_v27 }
 0x3eb   : > { %3553 = vrcp.f32 %v1960_v10 }
 0x3ec   : > { %v1930_v17 = vpop.xlane.xlu1 %1929  ;;  %3555 = vrcp.f32 %v1961_v22 }
 0x3ed   : > { %v3550_v8 = vpop.eup %3549 }
 0x3ee   : > { %v3552_v24 = vpop.eup %3551 }
 0x3f0   : > { %v1954_v13 = vpop.xlane.xlu1 %1953 }
 0x3f1   : > { %v1962_v16 = vadd.f32 %v1954_v13, %v1930_v17 }
 0x3f3   : > { %3557 = vrcp.f32 %v1962_v16 }
 0x3f5   : > { %v3554_v53 = vpop.eup %3553 }
 0x3f6   : > { %v3556_v42 = vpop.eup %3555 }
 0x3fd   : > { %v3558_v2 = vpop.eup %3557 }
 0x42a   : > { %v2404_v5 = vpop.f32.mrb[40].mxu0 }
 0x42b   : > { %v3304_v40 = vpop.f32.mrb[41].mxu0  ;;  %v2740_v9 = vmul.f32 %v3544_v43, %v2404_v5 }
 0x42c   : > { %v2407_v32 = vpop.f32.mrb[42].mxu0 }
 0x42d   : > { %v3305_v15 = vpop.f32.mrb[43].mxu0 }
 0x42e   : > { %v3033_v15 = vld [vmem:[%s4407_s8] ss:$0 sm:$0xff] }
 0x432   : > { %v2496_v58 = vpop.f32.mrb[44].mxu0 }
 0x433   : > { %v3316_v12 = vpop.f32.mrb[45].mxu0  ;;  %v2742_v14 = vmul.f32 %v3548_v59, %v2496_v58 }
 0x434   : > { %v2499_v6 = vpop.f32.mrb[46].mxu0 }
 0x435   : > { %v3317_v61 = vpop.f32.mrb[47].mxu0 }
 0x43a   : > { %v2588_v11 = vpop.f32.mrb[48].mxu0 }
 0x43b   : > { %v3328_v60 = vpop.f32.mrb[49].mxu0  ;;  %v2744_v26 = vmul.f32 %v3552_v24, %v2588_v11 }
 0x43c   : > { %v2450_v62 = vpop.f32.mrb[64].mxu1  ;;  %v2591_v38 = vpop.f32.mrb[50].mxu0 }
 0x43d   : > { %v2741_v45 = vmul.f32 %v3546_v28, %v2450_v62  ;;  %v3310_v44 = vpop.f32.mrb[65].mxu1  ;;  %v3329_v1 = vpop.f32.mrb[51].mxu0 }
 0x43e   : > { %v2453_v34 = vpop.f32.mrb[66].mxu1 }
 0x43f   : > { %v2748_v33 = vpack.c.bf16 %v2741_v45, %v2740_v9  ;;  %v3311_v48 = vpop.f32.mrb[67].mxu1 }
 0x441   : > { %3364 = vmatprep.mubr.bf16.mxu0 %v2748_v33 }
 0x442   : > { %v2680_v7 = vpop.f32.mrb[52].mxu0 }
 0x443   : > { %v3340_v55 = vpop.f32.mrb[53].mxu0  ;;  %v2746_v30 = vmul.f32 %v3556_v42, %v2680_v7 }
 0x444   : > { %v2542_v18 = vpop.f32.mrb[68].mxu1  ;;  %v2683_v0 = vpop.f32.mrb[54].mxu0 }
 0x445   : > { %v2743_v25 = vmul.f32 %v3550_v8, %v2542_v18  ;;  %v3322_v39 = vpop.f32.mrb[69].mxu1  ;;  %v3341_v49 = vpop.f32.mrb[55].mxu0 }
 0x446   : > { %v2545_v19 = vpop.f32.mrb[70].mxu1 }
 0x447   : > { %v2749_v54 = vpack.c.bf16 %v2743_v25, %v2742_v14  ;;  %v3323_v47 = vpop.f32.mrb[71].mxu1 }
 0x449   : > { %3365 = vmatmul.mubr.bf16.vlgmr.msra.gmra.mrb[56].mxu0 %v2749_v54 }
 0x44c   : > { %v2634_v52 = vpop.f32.mrb[72].mxu1 }
 0x44d   : > { %v2745_v4 = vmul.f32 %v3554_v53, %v2634_v52  ;;  %v3334_v51 = vpop.f32.mrb[73].mxu1 }
 0x44e   : > { %v2637_v21 = vpop.f32.mrb[74].mxu1 }
 0x44f   : > { %v2750_v57 = vpack.c.bf16 %v2745_v4, %v2744_v26  ;;  %v3335_v29 = vpop.f32.mrb[75].mxu1 }
 0x451   : > { %3368 = vmatprep.mubr.bf16.mxu0 %v2750_v57 }
 0x454   : > { %v2726_v36 = vpop.f32.mrb[76].mxu1 }
 0x455   : > { %v2747_v31 = vmul.f32 %v3558_v2, %v2726_v36  ;;  %v3346_v5 = vpop.f32.mrb[77].mxu1 }
 0x456   : > { %v2729_v40 = vpop.f32.mrb[78].mxu1 }
 0x457   : > { %v2751_v32 = vpack.c.bf16 %v2747_v31, %v2746_v30  ;;  %v3347_v37 = vpop.f32.mrb[79].mxu1 }
 0x459   : > { %3369 = vmatmul.mubr.bf16.gmra.mrb[60].mxu0 %v2751_v32 }
 0x51c   : > { %v3366_v23 = vpop.f32.mrb[56].mxu0 }
 0x51d   : > { %v2866_v41 = vadd.f32 %v3366_v23, %v3033_v15  ;;  %v2857_v27 = vpop.f32.mrb[57].mxu0 }
 0x51e   : > { %v2858_v58 = vadd.f32 %v3033_v15, %v2857_v27  ;;  %v3367_v12 = vpop.f32.mrb[58].mxu0 }
 0x51f   : > { %2890 = vst [vmem:[%s356_s13 + $0x10] sm:$0xff] %v2866_v41  ;;  %v2869_v35 = vadd.f32 %v3367_v12, %v3033_v15  ;;  %v2860_v6 = vpop.f32.mrb[59].mxu0 }
 0x520   : > { %2888 = vst [vmem:[%s356_s13] sm:$0xff] %v2858_v58  ;;  %v2861_v50 = vadd.f32 %v3033_v15, %v2860_v6 }
 0x521   : > { %2891 = vst [vmem:[%s356_s13 + $0x18] sm:$0xff] %v2869_v35 }
 0x522   : > { %2889 = vst [vmem:[%s356_s13 + $0x8] sm:$0xff] %v2861_v50 }
 0x52c   : > { %v3370_v63 = vpop.f32.mrb[60].mxu0 }
 0x52d   : > { %v2882_v61 = vadd.f32 %v3370_v63, %v3033_v15  ;;  %v2873_v46 = vpop.f32.mrb[61].mxu0 }
 0x52e   : > { %v2874_v56 = vadd.f32 %v3033_v15, %v2873_v46  ;;  %v3371_v11 = vpop.f32.mrb[62].mxu0 }
 0x52f   : > { %2894 = vst [vmem:[%s356_s13 + $0x30] sm:$0xff] %v2882_v61  ;;  %v2885_v43 = vadd.f32 %v3371_v11, %v3033_v15  ;;  %v2876_v17 = vpop.f32.mrb[63].mxu0 }
 0x530   : > { %2892 = vst [vmem:[%s356_s13 + $0x20] sm:$0xff] %v2874_v56  ;;  %v2877_v60 = vadd.f32 %v3033_v15, %v2876_v17 }
 0x531   : > { %2895 = vst [vmem:[%s356_s13 + $0x38] sm:$0xff] %v2885_v43 }
 0x532   : > { %2893 = vst [vmem:[%s356_s13 + $0x28] sm:$0xff] %v2877_v60 }
 0x533 PF: > { %s19_s30 = sadd.s32 1, %s3565_s30  }
 0x534   : > { %p16_p4 = scmp.ge.s32.totalorder %s19_s30, 4  }
 0x536   :  { %18 = sbr.rel (!%p16_p4) target bundleno = 1 (0x1), region = 89 }

</bundles_post_ra>
